<compile_context>
chip_gen: v5e
topology: v5e:2x2
jax: 0.10.0
libtpu: 0.0.40
codegen_flags: <defaults>
</compile_context>

<pallas_src>
import jax
import jax.numpy as jnp
import numpy as np
from jax.experimental import pallas as pl
from jax.experimental.pallas import tpu as pltpu

# Small, self-consistent shapes (downsample=None => inplanes == planes * expansion).
N, H, W = 2, 8, 8
INPLANES = 16
PLANES = 4
WIDTH = PLANES            # base_width=64, groups=1 -> width = planes
COUT = PLANES * 4         # expansion = 4 (== INPLANES so the residual add works)
C_PAD = 128               # lane width: all channel dims zero-padded to this
EPS = 1e-5


# --------------------------- Pallas kernel -----------------------------------

def _bottleneck_kernel(x_ref, w1_ref, w2_ref, w3_ref, b1_ref, b2_ref, b3_ref,
                       o_ref, xpad_ref):
    """Fused Bottleneck forward for the whole (small) batch in one grid step.

    x_ref    : (N, H, W, C_PAD)      f32   input (channels zero-padded)
    w1_ref   : (C_PAD, C_PAD)        bf16  1x1 conv1 weight, BN1 scale folded in
    w2_ref   : (9, C_PAD, C_PAD)     bf16  3x3 conv2 weight, one (Cin,Cout) slab per tap
    w3_ref   : (C_PAD, C_PAD)        bf16  1x1 conv3 weight, BN3 scale folded in
    b*_ref   : (1, C_PAD)            f32   folded BN shifts
    o_ref    : (N, H, W, C_PAD)      f32   output
    xpad_ref : (N, H+2, W+2, C_PAD)  f32   VMEM scratch: zero-padded conv1 output
    """
    n, h, w, c = x_ref.shape
    m = n * h * w

    x_f32 = x_ref[...].reshape(m, c)               # identity for the residual
    x_bf = x_f32.astype(jnp.bfloat16)

    # ---- conv1 (1x1) + bn1(shift) + relu : one MXU matmul over all M rows ---
    h1 = jnp.dot(x_bf, w1_ref[...], preferred_element_type=jnp.float32)
    h1 = jnp.maximum(h1 + b1_ref[...], 0.0)

    # ---- zero the halo border ONCE (scratch persists across grid steps and
    #      the interior is fully overwritten every step) ----------------------
    @pl.when(pl.program_id(0) == 0)
    def _():
        xpad_ref[...] = jnp.zeros_like(xpad_ref)

    # ---- stage conv1 output into the zero-padded VMEM scratch (3x3 halo,
    #      never touches HBM) -------------------------------------------------
    xpad_ref[:, 1:h + 1, 1:w + 1, :] = h1.reshape(n, h, w, c)

    # ---- conv2 (3x3, pad=1) + bn2(shift) + relu : 9 accumulating matmuls ----
    # Each tap reads a shifted (N,H,W,C) window of the halo scratch and feeds
    # the MXU directly (no im2col concat buffer); accumulation stays in f32.
    def tap_dot(kh, kw):
        patch = xpad_ref[:, kh:kh + h, kw:kw + w, :].reshape(m, c)
        return jnp.dot(patch.astype(jnp.bfloat16), w2_ref[kh * 3 + kw],
                       preferred_element_type=jnp.float32)

    h2 = tap_dot(0, 0)
    for kh in range(3):
        for kw in range(3):
            if kh == 0 and kw == 0:
                continue
            h2 = h2 + tap_dot(kh, kw)
    h2 = jnp.maximum(h2 + b2_ref[...], 0.0)

    # ---- conv3 (1x1) + bn3(shift) + residual + relu -------------------------
    h3 = jnp.dot(h2.astype(jnp.bfloat16), w3_ref[...],
                 preferred_element_type=jnp.float32)
    out = jnp.maximum(h3 + b3_ref[...] + x_f32, 0.0)
    o_ref[...] = out.reshape(n, h, w, c)            # lane-dense (last dim 128)


# --------------------------- wrapper ------------------------------------------

def bottleneck_forward(x_nhwc, kp):
    """x_nhwc: (N, H, W, INPLANES) f32 -> (N, H, W, C_PAD) f32 (128-padded NHWC).

    Padded lanes [COUT:] are exact zeros; consumers should keep this layout
    (slicing to COUT in the wrapper would add a full extra HBM pass).
    """
    n, h, w, cin = x_nhwc.shape
    # Zero-pad channels to the 128-lane width (exact: zeros contribute nothing).
    # TODO(synk): at real ResNet widths do this padding inside VMEM instead.
    x_pad = jnp.zeros((n, h, w, C_PAD), jnp.float32).at[..., :cin].set(x_nhwc)

    grid_spec = pltpu.PrefetchScalarGridSpec(
        num_scalar_prefetch=0,
        grid=(1,),   # whole batch in one step: M = N*H*W rows per matmul
        in_specs=[
            pl.BlockSpec((n, h, w, C_PAD), lambda i: (0, 0, 0, 0)),   # x
            pl.BlockSpec((C_PAD, C_PAD), lambda i: (0, 0)),           # w1
            pl.BlockSpec((9, C_PAD, C_PAD), lambda i: (0, 0, 0)),     # w2 taps
            pl.BlockSpec((C_PAD, C_PAD), lambda i: (0, 0)),           # w3
            pl.BlockSpec((1, C_PAD), lambda i: (0, 0)),               # b1
            pl.BlockSpec((1, C_PAD), lambda i: (0, 0)),               # b2
            pl.BlockSpec((1, C_PAD), lambda i: (0, 0)),               # b3
        ],
        out_specs=pl.BlockSpec((n, h, w, C_PAD), lambda i: (0, 0, 0, 0)),
        scratch_shapes=[pltpu.VMEM((n, h + 2, w + 2, C_PAD), jnp.float32)],
    )

    return pl.pallas_call(
        _bottleneck_kernel,
        out_shape=jax.ShapeDtypeStruct((n, h, w, C_PAD), jnp.float32),
        grid_spec=grid_spec,
        compiler_params=pltpu.CompilerParams(
            # Single grid step: no megacore split (per-step work is too small
            # to amortize a 2-TC split at these shapes).
            dimension_semantics=("arbitrary",),
            vmem_limit_bytes=32 * 1024 * 1024),       # v7x-safe (64 MiB VMEM)
    )(x_pad, kp["w1"], kp["w2"], kp["w3"], kp["b1"], kp["b2"], kp["b3"])


# --------------------------- deterministic params -----------------------------

def _fold_bn(gamma, beta, mean, var):
    scale = gamma * jax.lax.rsqrt(var + EPS)
    shift = beta - mean * scale
    return scale, shift


def make_raw_params(key):
    ks = jax.random.split(key, 15)
    w1 = jax.random.normal(ks[0], (INPLANES, WIDTH), jnp.float32) * 0.1      # 1x1
    w2 = jax.random.normal(ks[1], (3, 3, WIDTH, WIDTH), jnp.float32) * 0.1   # HWIO
    w3 = jax.random.normal(ks[2], (WIDTH, COUT), jnp.float32) * 0.1          # 1x1
    bn = []
    for i in range(3):
        c = WIDTH if i < 2 else COUT
        g = jax.random.uniform(ks[3 + 4 * i], (c,), jnp.float32, 0.8, 1.2)
        b = jax.random.normal(ks[4 + 4 * i], (c,), jnp.float32) * 0.1
        mu = jax.random.normal(ks[5 + 4 * i], (c,), jnp.float32) * 0.1
        var = jax.random.uniform(ks[6 + 4 * i], (c,), jnp.float32, 0.5, 1.5)
        bn.append((g, b, mu, var))
    return dict(w1=w1, w2=w2, w3=w3, bn1=bn[0], bn2=bn[1], bn3=bn[2])


def prepare_kernel_params(raw):
    """Fold BN scale into conv weights, zero-pad channels to 128, cast to bf16."""
    s1, t1 = _fold_bn(*raw["bn1"])
    s2, t2 = _fold_bn(*raw["bn2"])
    s3, t3 = _fold_bn(*raw["bn3"])
    w1f = raw["w1"] * s1[None, :]
    w2f = raw["w2"] * s2[None, None, None, :]
    w3f = raw["w3"] * s3[None, :]

    w1p = jnp.zeros((C_PAD, C_PAD), jnp.float32).at[:INPLANES, :WIDTH].set(w1f)
    w2p = jnp.zeros((3, 3, C_PAD, C_PAD), jnp.float32).at[:, :, :WIDTH, :WIDTH].set(w2f)
    w3p = jnp.zeros((C_PAD, C_PAD), jnp.float32).at[:WIDTH, :COUT].set(w3f)

    b1p = jnp.zeros((1, C_PAD), jnp.float32).at[0, :WIDTH].set(t1)
    b2p = jnp.zeros((1, C_PAD), jnp.float32).at[0, :WIDTH].set(t2)
    b3p = jnp.zeros((1, C_PAD), jnp.float32).at[0, :COUT].set(t3)

    return dict(w1=w1p.astype(jnp.bfloat16),
                w2=w2p.reshape(9, C_PAD, C_PAD).astype(jnp.bfloat16),  # per-tap slabs
                w3=w3p.astype(jnp.bfloat16),
                b1=b1p, b2=b2p, b3=b3p)


# --------------------------- pure-JAX references -------------------------------

def bottleneck_reference(x_nhwc, raw):
    """f32 reference of the PyTorch module (eval-mode BN)."""
    dn = ("NHWC", "HWIO", "NHWC")
    hp = jax.lax.Precision.HIGHEST

    def bn(y, g, b, mu, var):
        return (y - mu) * jax.lax.rsqrt(var + EPS) * g + b

    w1 = raw["w1"].reshape(1, 1, INPLANES, WIDTH)
    w3 = raw["w3"].reshape(1, 1, WIDTH, COUT)
    out = jax.lax.conv_general_dilated(x_nhwc, w1, (1, 1), "VALID",
                                       dimension_numbers=dn, precision=hp)
    out = jax.nn.relu(bn(out, *raw["bn1"]))
    out = jax.lax.conv_general_dilated(out, raw["w2"], (1, 1),
                                       ((1, 1), (1, 1)), dimension_numbers=dn,
                                       precision=hp)
    out = jax.nn.relu(bn(out, *raw["bn2"]))
    out = jax.lax.conv_general_dilated(out, w3, (1, 1), "VALID",
                                       dimension_numbers=dn, precision=hp)
    out = bn(out, *raw["bn3"])
    return jax.nn.relu(out + x_nhwc)


def bottleneck_reference_mirrored(x_nhwc, kp):
    """Mirrors the kernel's exact arithmetic (bf16 operands, f32 accumulate)."""
    dn = ("NHWC", "HWIO", "NHWC")
    hp = jax.lax.Precision.HIGHEST
    n, h, w, cin = x_nhwc.shape
    m = n * h * w
    x_pad = jnp.zeros((n, h, w, C_PAD), jnp.float32).at[..., :cin].set(x_nhwc)
    xb = x_pad.astype(jnp.bfloat16).astype(jnp.float32)
    w1 = kp["w1"].astype(jnp.float32)
    w2 = kp["w2"].astype(jnp.float32).reshape(3, 3, C_PAD, C_PAD)
    w3 = kp["w3"].astype(jnp.float32)

    h1 = jnp.maximum(jnp.dot(xb.reshape(m, C_PAD), w1, precision=hp) + kp["b1"], 0.0)
    h1 = h1.astype(jnp.bfloat16).astype(jnp.float32).reshape(n, h, w, C_PAD)
    h2 = jax.lax.conv_general_dilated(h1, w2, (1, 1), ((1, 1), (1, 1)),
                                      dimension_numbers=dn, precision=hp)
    h2 = jnp.maximum(h2 + kp["b2"].reshape(1, 1, 1, C_PAD), 0.0)
    h2 = h2.astype(jnp.bfloat16).astype(jnp.float32)
    h3 = jnp.dot(h2.reshape(m, C_PAD), w3, precision=hp) + kp["b3"]
    out = jnp.maximum(h3.reshape(n, h, w, C_PAD) + x_pad, 0.0)
    return out[..., :COUT]


# --------------------------- main ----------------------------------------------

if __name__ == "__main__":
    key = jax.random.PRNGKey(0)
    kx, kparam = jax.random.split(key)
    x = jax.random.normal(kx, (N, H, W, INPLANES), jnp.float32)   # NHWC

    raw = make_raw_params(kparam)
    kp = prepare_kernel_params(raw)

    out_pad = jax.block_until_ready(bottleneck_forward(x, kp))
    out_pad_np = np.asarray(out_pad)
    out = out_pad_np[..., :COUT]                    # test-side slice only

    # Padded lanes are provably exact zeros (zero weights/biases/residual).
    assert np.all(out_pad_np[..., COUT:] == 0.0)

    # Tight check: same bf16-rounded operands / f32 accumulation as the kernel.
    ref_exact = jax.block_until_ready(bottleneck_reference_mirrored(x, kp))
    np.testing.assert_allclose(out, np.asarray(ref_exact), rtol=5e-3, atol=5e-3)

    # Module-semantics check vs. the raw f32 conv+BN+relu pipeline
    # (looser tolerance accounts for bf16 matmul operands in the kernel).
    ref_mod = jax.block_until_ready(bottleneck_reference(x, raw))
    np.testing.assert_allclose(out, np.asarray(ref_mod), rtol=3e-2, atol=3e-2)

    print("KERNEL_OK")
</pallas_src>

<mosaic_0001>
module attributes {stable_mosaic.version = 11 : i64} {
  func.func @_bottleneck_kernel(%arg0: i32, %arg1: memref<2x8x8x128xf32, #tpu.memory_space<vmem>>, %arg2: memref<128x128xbf16, #tpu.memory_space<vmem>>, %arg3: memref<9x128x128xbf16, #tpu.memory_space<vmem>>, %arg4: memref<128x128xbf16, #tpu.memory_space<vmem>>, %arg5: memref<1x128xf32, #tpu.memory_space<vmem>>, %arg6: memref<1x128xf32, #tpu.memory_space<vmem>>, %arg7: memref<1x128xf32, #tpu.memory_space<vmem>>, %arg8: memref<2x8x8x128xf32, #tpu.memory_space<vmem>>, %arg9: memref<2x10x10x128xf32, #tpu.memory_space<vmem>>) attributes {dimension_semantics = [#tpu.dimension_semantics<arbitrary>], iteration_bounds = array<i64: 1>, scalar_prefetch = 0 : i64, scratch_operands = 1 : i64, tpu.core_type = #tpu.core_type<tc>, window_params = [{pipeline_mode = #tpu.pipeline_mode<synchronous>, transform_indices = @transform_0, window_bounds = array<i64: 2, 8, 8, 128>}, {pipeline_mode = #tpu.pipeline_mode<synchronous>, transform_indices = @transform_1, window_bounds = array<i64: 128, 128>}, {pipeline_mode = #tpu.pipeline_mode<synchronous>, transform_indices = @transform_2, window_bounds = array<i64: 9, 128, 128>}, {pipeline_mode = #tpu.pipeline_mode<synchronous>, transform_indices = @transform_3, window_bounds = array<i64: 128, 128>}, {pipeline_mode = #tpu.pipeline_mode<synchronous>, transform_indices = @transform_4, window_bounds = array<i64: 1, 128>}, {pipeline_mode = #tpu.pipeline_mode<synchronous>, transform_indices = @transform_5, window_bounds = array<i64: 1, 128>}, {pipeline_mode = #tpu.pipeline_mode<synchronous>, transform_indices = @transform_6, window_bounds = array<i64: 1, 128>}, {pipeline_mode = #tpu.pipeline_mode<synchronous>, transform_indices = @transform_7, window_bounds = array<i64: 2, 8, 8, 128>}]} {
    %c0 = arith.constant 0 : index
    %c0_0 = arith.constant 0 : index
    %c0_1 = arith.constant 0 : index
    %c0_2 = arith.constant 0 : index
    %0 = vector.load %arg1[%c0, %c0_0, %c0_1, %c0_2] : memref<2x8x8x128xf32, #tpu.memory_space<vmem>>, vector<2x8x8x128xf32>
    %1 = vector.shape_cast %0 : vector<2x8x8x128xf32> to vector<128x128xf32>
    %2 = arith.truncf %1 : vector<128x128xf32> to vector<128x128xbf16>
    %c0_3 = arith.constant 0 : index
    %c0_4 = arith.constant 0 : index
    %3 = vector.load %arg2[%c0_3, %c0_4] : memref<128x128xbf16, #tpu.memory_space<vmem>>, vector<128x128xbf16>
    %cst = arith.constant dense<0.000000e+00> : vector<128x128xf32>
    %4 = tpu.matmul %2, %3, %cst {dimension_numbers = #tpu.dot_dimension_numbers<[1], [0], [0], [1], [0, 0, 1, 1], [], []>} : vector<128x128xbf16>, vector<128x128xbf16>, vector<128x128xf32> -> vector<128x128xf32>
    %c0_5 = arith.constant 0 : index
    %c0_6 = arith.constant 0 : index
    %5 = vector.load %arg5[%c0_5, %c0_6] : memref<1x128xf32, #tpu.memory_space<vmem>>, vector<1x128xf32>
    %6 = vector.broadcast %5 : vector<1x128xf32> to vector<128x128xf32>
    %7 = arith.addf %4, %6 : vector<128x128xf32>
    %cst_7 = arith.constant 0.000000e+00 : f32
    %8 = vector.broadcast %cst_7 : f32 to vector<128x128xf32>
    %9 = arith.maximumf %7, %8 : vector<128x128xf32>
    %c0_i32 = arith.constant 0 : i32
    %10 = arith.cmpi eq, %arg0, %c0_i32 : i32
    %11 = arith.extui %10 : i1 to i32
    %c0_i32_8 = arith.constant 0 : i32
    %12 = arith.cmpi ne, %11, %c0_i32_8 : i32
    scf.if %12 {
      %cst_90 = arith.constant 0.000000e+00 : f32
      %93 = vector.broadcast %cst_90 : f32 to vector<2x10x10x128xf32>
      %c0_91 = arith.constant 0 : index
      %c0_92 = arith.constant 0 : index
      %c0_93 = arith.constant 0 : index
      %c0_94 = arith.constant 0 : index
      %94 = vector.load %arg9[%c0_91, %c0_92, %c0_93, %c0_94] : memref<2x10x10x128xf32, #tpu.memory_space<vmem>>, vector<2x10x10x128xf32>
      tpu.vector_store %arg9[%c0_91, %c0_92, %c0_93, %c0_94], %93 {strides = array<i32>} : memref<2x10x10x128xf32, #tpu.memory_space<vmem>>, vector<2x10x10x128xf32>,
    } else {
    }
    %13 = vector.shape_cast %9 : vector<128x128xf32> to vector<2x8x8x128xf32>
    %c0_9 = arith.constant 0 : index
    %c1 = arith.constant 1 : index
    %c1_10 = arith.constant 1 : index
    %c0_11 = arith.constant 0 : index
    %14 = vector.load %arg9[%c0_9, %c1, %c1_10, %c0_11] : memref<2x10x10x128xf32, #tpu.memory_space<vmem>>, vector<2x8x8x128xf32>
    tpu.vector_store %arg9[%c0_9, %c1, %c1_10, %c0_11], %13 {strides = array<i32>} : memref<2x10x10x128xf32, #tpu.memory_space<vmem>>, vector<2x8x8x128xf32>,
    %c0_12 = arith.constant 0 : index
    %c0_13 = arith.constant 0 : index
    %c0_14 = arith.constant 0 : index
    %c0_15 = arith.constant 0 : index
    %15 = vector.load %arg9[%c0_12, %c0_13, %c0_14, %c0_15] : memref<2x10x10x128xf32, #tpu.memory_space<vmem>>, vector<2x8x8x128xf32>
    %16 = vector.shape_cast %15 : vector<2x8x8x128xf32> to vector<128x128xf32>
    %17 = arith.truncf %16 : vector<128x128xf32> to vector<128x128xbf16>
    %c0_16 = arith.constant 0 : index
    %c0_17 = arith.constant 0 : index
    %c0_18 = arith.constant 0 : index
    %18 = vector.load %arg3[%c0_16, %c0_17, %c0_18] : memref<9x128x128xbf16, #tpu.memory_space<vmem>>, vector<1x128x128xbf16>
    %19 = vector.shape_cast %18 : vector<1x128x128xbf16> to vector<128x128xbf16>
    %cst_19 = arith.constant dense<0.000000e+00> : vector<128x128xf32>
    %20 = tpu.matmul %17, %19, %cst_19 {dimension_numbers = #tpu.dot_dimension_numbers<[1], [0], [0], [1], [0, 0, 1, 1], [], []>} : vector<128x128xbf16>, vector<128x128xbf16>, vector<128x128xf32> -> vector<128x128xf32>
    %c0_20 = arith.constant 0 : index
    %c0_21 = arith.constant 0 : index
    %c1_22 = arith.constant 1 : index
    %c0_23 = arith.constant 0 : index
    %21 = vector.load %arg9[%c0_20, %c0_21, %c1_22, %c0_23] : memref<2x10x10x128xf32, #tpu.memory_space<vmem>>, vector<2x8x8x128xf32>
    %22 = vector.shape_cast %21 : vector<2x8x8x128xf32> to vector<128x128xf32>
    %23 = arith.truncf %22 : vector<128x128xf32> to vector<128x128xbf16>
    %c1_24 = arith.constant 1 : index
    %c0_25 = arith.constant 0 : index
    %c0_26 = arith.constant 0 : index
    %24 = vector.load %arg3[%c1_24, %c0_25, %c0_26] : memref<9x128x128xbf16, #tpu.memory_space<vmem>>, vector<1x128x128xbf16>
    %25 = vector.shape_cast %24 : vector<1x128x128xbf16> to vector<128x128xbf16>
    %cst_27 = arith.constant dense<0.000000e+00> : vector<128x128xf32>
    %26 = tpu.matmul %23, %25, %cst_27 {dimension_numbers = #tpu.dot_dimension_numbers<[1], [0], [0], [1], [0, 0, 1, 1], [], []>} : vector<128x128xbf16>, vector<128x128xbf16>, vector<128x128xf32> -> vector<128x128xf32>
    %27 = arith.addf %20, %26 : vector<128x128xf32>
    %c0_28 = arith.constant 0 : index
    %c0_29 = arith.constant 0 : index
    %c2 = arith.constant 2 : index
    %c0_30 = arith.constant 0 : index
    %28 = vector.load %arg9[%c0_28, %c0_29, %c2, %c0_30] : memref<2x10x10x128xf32, #tpu.memory_space<vmem>>, vector<2x8x8x128xf32>
    %29 = vector.shape_cast %28 : vector<2x8x8x128xf32> to vector<128x128xf32>
    %30 = arith.truncf %29 : vector<128x128xf32> to vector<128x128xbf16>
    %c2_31 = arith.constant 2 : index
    %c0_32 = arith.constant 0 : index
    %c0_33 = arith.constant 0 : index
    %31 = vector.load %arg3[%c2_31, %c0_32, %c0_33] : memref<9x128x128xbf16, #tpu.memory_space<vmem>>, vector<1x128x128xbf16>
    %32 = vector.shape_cast %31 : vector<1x128x128xbf16> to vector<128x128xbf16>
    %cst_34 = arith.constant dense<0.000000e+00> : vector<128x128xf32>
    %33 = tpu.matmul %30, %32, %cst_34 {dimension_numbers = #tpu.dot_dimension_numbers<[1], [0], [0], [1], [0, 0, 1, 1], [], []>} : vector<128x128xbf16>, vector<128x128xbf16>, vector<128x128xf32> -> vector<128x128xf32>
    %34 = arith.addf %27, %33 : vector<128x128xf32>
    %c0_35 = arith.constant 0 : index
    %c1_36 = arith.constant 1 : index
    %c0_37 = arith.constant 0 : index
    %c0_38 = arith.constant 0 : index
    %35 = vector.load %arg9[%c0_35, %c1_36, %c0_37, %c0_38] : memref<2x10x10x128xf32, #tpu.memory_space<vmem>>, vector<2x8x8x128xf32>
    %36 = vector.shape_cast %35 : vector<2x8x8x128xf32> to vector<128x128xf32>
    %37 = arith.truncf %36 : vector<128x128xf32> to vector<128x128xbf16>
    %c3 = arith.constant 3 : index
    %c0_39 = arith.constant 0 : index
    %c0_40 = arith.constant 0 : index
    %38 = vector.load %arg3[%c3, %c0_39, %c0_40] : memref<9x128x128xbf16, #tpu.memory_space<vmem>>, vector<1x128x128xbf16>
    %39 = vector.shape_cast %38 : vector<1x128x128xbf16> to vector<128x128xbf16>
    %cst_41 = arith.constant dense<0.000000e+00> : vector<128x128xf32>
    %40 = tpu.matmul %37, %39, %cst_41 {dimension_numbers = #tpu.dot_dimension_numbers<[1], [0], [0], [1], [0, 0, 1, 1], [], []>} : vector<128x128xbf16>, vector<128x128xbf16>, vector<128x128xf32> -> vector<128x128xf32>
    %41 = arith.addf %34, %40 : vector<128x128xf32>
    %c0_42 = arith.constant 0 : index
    %c1_43 = arith.constant 1 : index
    %c1_44 = arith.constant 1 : index
    %c0_45 = arith.constant 0 : index
    %42 = vector.load %arg9[%c0_42, %c1_43, %c1_44, %c0_45] : memref<2x10x10x128xf32, #tpu.memory_space<vmem>>, vector<2x8x8x128xf32>
    %43 = vector.shape_cast %42 : vector<2x8x8x128xf32> to vector<128x128xf32>
    %44 = arith.truncf %43 : vector<128x128xf32> to vector<128x128xbf16>
    %c4 = arith.constant 4 : index
    %c0_46 = arith.constant 0 : index
    %c0_47 = arith.constant 0 : index
    %45 = vector.load %arg3[%c4, %c0_46, %c0_47] : memref<9x128x128xbf16, #tpu.memory_space<vmem>>, vector<1x128x128xbf16>
    %46 = vector.shape_cast %45 : vector<1x128x128xbf16> to vector<128x128xbf16>
    %cst_48 = arith.constant dense<0.000000e+00> : vector<128x128xf32>
    %47 = tpu.matmul %44, %46, %cst_48 {dimension_numbers = #tpu.dot_dimension_numbers<[1], [0], [0], [1], [0, 0, 1, 1], [], []>} : vector<128x128xbf16>, vector<128x128xbf16>, vector<128x128xf32> -> vector<128x128xf32>
    %48 = arith.addf %41, %47 : vector<128x128xf32>
    %c0_49 = arith.constant 0 : index
    %c1_50 = arith.constant 1 : index
    %c2_51 = arith.constant 2 : index
    %c0_52 = arith.constant 0 : index
    %49 = vector.load %arg9[%c0_49, %c1_50, %c2_51, %c0_52] : memref<2x10x10x128xf32, #tpu.memory_space<vmem>>, vector<2x8x8x128xf32>
    %50 = vector.shape_cast %49 : vector<2x8x8x128xf32> to vector<128x128xf32>
    %51 = arith.truncf %50 : vector<128x128xf32> to vector<128x128xbf16>
    %c5 = arith.constant 5 : index
    %c0_53 = arith.constant 0 : index
    %c0_54 = arith.constant 0 : index
    %52 = vector.load %arg3[%c5, %c0_53, %c0_54] : memref<9x128x128xbf16, #tpu.memory_space<vmem>>, vector<1x128x128xbf16>
    %53 = vector.shape_cast %52 : vector<1x128x128xbf16> to vector<128x128xbf16>
    %cst_55 = arith.constant dense<0.000000e+00> : vector<128x128xf32>
    %54 = tpu.matmul %51, %53, %cst_55 {dimension_numbers = #tpu.dot_dimension_numbers<[1], [0], [0], [1], [0, 0, 1, 1], [], []>} : vector<128x128xbf16>, vector<128x128xbf16>, vector<128x128xf32> -> vector<128x128xf32>
    %55 = arith.addf %48, %54 : vector<128x128xf32>
    %c0_56 = arith.constant 0 : index
    %c2_57 = arith.constant 2 : index
    %c0_58 = arith.constant 0 : index
    %c0_59 = arith.constant 0 : index
    %56 = vector.load %arg9[%c0_56, %c2_57, %c0_58, %c0_59] : memref<2x10x10x128xf32, #tpu.memory_space<vmem>>, vector<2x8x8x128xf32>
    %57 = vector.shape_cast %56 : vector<2x8x8x128xf32> to vector<128x128xf32>
    %58 = arith.truncf %57 : vector<128x128xf32> to vector<128x128xbf16>
    %c6 = arith.constant 6 : index
    %c0_60 = arith.constant 0 : index
    %c0_61 = arith.constant 0 : index
    %59 = vector.load %arg3[%c6, %c0_60, %c0_61] : memref<9x128x128xbf16, #tpu.memory_space<vmem>>, vector<1x128x128xbf16>
    %60 = vector.shape_cast %59 : vector<1x128x128xbf16> to vector<128x128xbf16>
    %cst_62 = arith.constant dense<0.000000e+00> : vector<128x128xf32>
    %61 = tpu.matmul %58, %60, %cst_62 {dimension_numbers = #tpu.dot_dimension_numbers<[1], [0], [0], [1], [0, 0, 1, 1], [], []>} : vector<128x128xbf16>, vector<128x128xbf16>, vector<128x128xf32> -> vector<128x128xf32>
    %62 = arith.addf %55, %61 : vector<128x128xf32>
    %c0_63 = arith.constant 0 : index
    %c2_64 = arith.constant 2 : index
    %c1_65 = arith.constant 1 : index
    %c0_66 = arith.constant 0 : index
    %63 = vector.load %arg9[%c0_63, %c2_64, %c1_65, %c0_66] : memref<2x10x10x128xf32, #tpu.memory_space<vmem>>, vector<2x8x8x128xf32>
    %64 = vector.shape_cast %63 : vector<2x8x8x128xf32> to vector<128x128xf32>
    %65 = arith.truncf %64 : vector<128x128xf32> to vector<128x128xbf16>
    %c7 = arith.constant 7 : index
    %c0_67 = arith.constant 0 : index
    %c0_68 = arith.constant 0 : index
    %66 = vector.load %arg3[%c7, %c0_67, %c0_68] : memref<9x128x128xbf16, #tpu.memory_space<vmem>>, vector<1x128x128xbf16>
    %67 = vector.shape_cast %66 : vector<1x128x128xbf16> to vector<128x128xbf16>
    %cst_69 = arith.constant dense<0.000000e+00> : vector<128x128xf32>
    %68 = tpu.matmul %65, %67, %cst_69 {dimension_numbers = #tpu.dot_dimension_numbers<[1], [0], [0], [1], [0, 0, 1, 1], [], []>} : vector<128x128xbf16>, vector<128x128xbf16>, vector<128x128xf32> -> vector<128x128xf32>
    %69 = arith.addf %62, %68 : vector<128x128xf32>
    %c0_70 = arith.constant 0 : index
    %c2_71 = arith.constant 2 : index
    %c2_72 = arith.constant 2 : index
    %c0_73 = arith.constant 0 : index
    %70 = vector.load %arg9[%c0_70, %c2_71, %c2_72, %c0_73] : memref<2x10x10x128xf32, #tpu.memory_space<vmem>>, vector<2x8x8x128xf32>
    %71 = vector.shape_cast %70 : vector<2x8x8x128xf32> to vector<128x128xf32>
    %72 = arith.truncf %71 : vector<128x128xf32> to vector<128x128xbf16>
    %c8 = arith.constant 8 : index
    %c0_74 = arith.constant 0 : index
    %c0_75 = arith.constant 0 : index
    %73 = vector.load %arg3[%c8, %c0_74, %c0_75] : memref<9x128x128xbf16, #tpu.memory_space<vmem>>, vector<1x128x128xbf16>
    %74 = vector.shape_cast %73 : vector<1x128x128xbf16> to vector<128x128xbf16>
    %cst_76 = arith.constant dense<0.000000e+00> : vector<128x128xf32>
    %75 = tpu.matmul %72, %74, %cst_76 {dimension_numbers = #tpu.dot_dimension_numbers<[1], [0], [0], [1], [0, 0, 1, 1], [], []>} : vector<128x128xbf16>, vector<128x128xbf16>, vector<128x128xf32> -> vector<128x128xf32>
    %76 = arith.addf %69, %75 : vector<128x128xf32>
    %c0_77 = arith.constant 0 : index
    %c0_78 = arith.constant 0 : index
    %77 = vector.load %arg6[%c0_77, %c0_78] : memref<1x128xf32, #tpu.memory_space<vmem>>, vector<1x128xf32>
    %78 = vector.broadcast %77 : vector<1x128xf32> to vector<128x128xf32>
    %79 = arith.addf %76, %78 : vector<128x128xf32>
    %cst_79 = arith.constant 0.000000e+00 : f32
    %80 = vector.broadcast %cst_79 : f32 to vector<128x128xf32>
    %81 = arith.maximumf %79, %80 : vector<128x128xf32>
    %82 = arith.truncf %81 : vector<128x128xf32> to vector<128x128xbf16>
    %c0_80 = arith.constant 0 : index
    %c0_81 = arith.constant 0 : index
    %83 = vector.load %arg4[%c0_80, %c0_81] : memref<128x128xbf16, #tpu.memory_space<vmem>>, vector<128x128xbf16>
    %cst_82 = arith.constant dense<0.000000e+00> : vector<128x128xf32>
    %84 = tpu.matmul %82, %83, %cst_82 {dimension_numbers = #tpu.dot_dimension_numbers<[1], [0], [0], [1], [0, 0, 1, 1], [], []>} : vector<128x128xbf16>, vector<128x128xbf16>, vector<128x128xf32> -> vector<128x128xf32>
    %c0_83 = arith.constant 0 : index
    %c0_84 = arith.constant 0 : index
    %85 = vector.load %arg7[%c0_83, %c0_84] : memref<1x128xf32, #tpu.memory_space<vmem>>, vector<1x128xf32>
    %86 = vector.broadcast %85 : vector<1x128xf32> to vector<128x128xf32>
    %87 = arith.addf %84, %86 : vector<128x128xf32>
    %88 = arith.addf %87, %1 : vector<128x128xf32>
    %cst_85 = arith.constant 0.000000e+00 : f32
    %89 = vector.broadcast %cst_85 : f32 to vector<128x128xf32>
    %90 = arith.maximumf %88, %89 : vector<128x128xf32>
    %91 = vector.shape_cast %90 : vector<128x128xf32> to vector<2x8x8x128xf32>
    %c0_86 = arith.constant 0 : index
    %c0_87 = arith.constant 0 : index
    %c0_88 = arith.constant 0 : index
    %c0_89 = arith.constant 0 : index
    %92 = vector.load %arg8[%c0_86, %c0_87, %c0_88, %c0_89] : memref<2x8x8x128xf32, #tpu.memory_space<vmem>>, vector<2x8x8x128xf32>
    tpu.vector_store %arg8[%c0_86, %c0_87, %c0_88, %c0_89], %91 {strides = array<i32>} : memref<2x8x8x128xf32, #tpu.memory_space<vmem>>, vector<2x8x8x128xf32>,
    return
  }
  func.func @transform_0(%arg0: i32) -> (i32, i32, i32, i32) {
    %c0_i32 = arith.constant 0 : i32
    %c0_i32_0 = arith.constant 0 : i32
    %c0_i32_1 = arith.constant 0 : i32
    %c0_i32_2 = arith.constant 0 : i32
    %c0_i32_3 = arith.constant 0 : i32
    return %c0_i32, %c0_i32_0, %c0_i32_1, %c0_i32_2 : i32, i32, i32, i32
  }
  func.func @transform_1(%arg0: i32) -> (i32, i32) {
    %c0_i32 = arith.constant 0 : i32
    %c0_i32_0 = arith.constant 0 : i32
    %c0_i32_1 = arith.constant 0 : i32
    return %c0_i32, %c0_i32_0 : i32, i32
  }
  func.func @transform_2(%arg0: i32) -> (i32, i32, i32) {
    %c0_i32 = arith.constant 0 : i32
    %c0_i32_0 = arith.constant 0 : i32
    %c0_i32_1 = arith.constant 0 : i32
    %c0_i32_2 = arith.constant 0 : i32
    return %c0_i32, %c0_i32_0, %c0_i32_1 : i32, i32, i32
  }
  func.func @transform_3(%arg0: i32) -> (i32, i32) {
    %c0_i32 = arith.constant 0 : i32
    %c0_i32_0 = arith.constant 0 : i32
    %c0_i32_1 = arith.constant 0 : i32
    return %c0_i32, %c0_i32_0 : i32, i32
  }
  func.func @transform_4(%arg0: i32) -> (i32, i32) {
    %c0_i32 = arith.constant 0 : i32
    %c0_i32_0 = arith.constant 0 : i32
    %c0_i32_1 = arith.constant 0 : i32
    return %c0_i32, %c0_i32_0 : i32, i32
  }
  func.func @transform_5(%arg0: i32) -> (i32, i32) {
    %c0_i32 = arith.constant 0 : i32
    %c0_i32_0 = arith.constant 0 : i32
    %c0_i32_1 = arith.constant 0 : i32
    return %c0_i32, %c0_i32_0 : i32, i32
  }
  func.func @transform_6(%arg0: i32) -> (i32, i32) {
    %c0_i32 = arith.constant 0 : i32
    %c0_i32_0 = arith.constant 0 : i32
    %c0_i32_1 = arith.constant 0 : i32
    return %c0_i32, %c0_i32_0 : i32, i32
  }
  func.func @transform_7(%arg0: i32) -> (i32, i32, i32, i32) {
    %c0_i32 = arith.constant 0 : i32
    %c0_i32_0 = arith.constant 0 : i32
    %c0_i32_1 = arith.constant 0 : i32
    %c0_i32_2 = arith.constant 0 : i32
    %c0_i32_3 = arith.constant 0 : i32
    return %c0_i32, %c0_i32_0, %c0_i32_1, %c0_i32_2 : i32, i32, i32, i32
  }
}

</mosaic_0001>

<bundles_post_ra>
// kernel: tpu_custom_call.1
= control target key start
LH: loop header
LB: loop body
LE: loop exit
PB: predicated region body
PF: predicated region fallthrough
CT: control target
= control target key end

     0   :  { %12 = vsyncpa [#allocation4], 0  ;;  %s3056_s0 = inlined_call_operand.hbm [shape: f32[2,8,8,128], index: 0, kind: input, shape index: {}]   ;;  %s3057_s1 = inlined_call_operand.hbm [shape: bf16[128,128], index: 1, kind: input, shape index: {}]   ;;  %s3058_s2 = inlined_call_operand.hbm [shape: bf16[9,128,128], index: 2, kind: input, shape index: {}]   ;;  %s3059_s3 = inlined_call_operand.hbm [shape: bf16[128,128], index: 3, kind: input, shape index: {}]   ;;  %s3060_s4 = inlined_call_operand.vmem [shape: f32[1,128], index: 4, kind: input, shape index: {}]   ;;  %s3061_s5 = inlined_call_operand.vmem [shape: f32[1,128], index: 5, kind: input, shape index: {}]   ;;  %s3062_s6 = inlined_call_operand.vmem [shape: f32[1,128], index: 6, kind: input, shape index: {}]   ;;  %s3063_s7 = inlined_call_operand.hbm [shape: f32[2,8,8,128], index: 7, kind: output, shape index: {}]  }
   0x1   :  { %13 = vsyncpa [#allocation7], 0 }
   0x2   :  { %14 = vsyncpa [#allocation10], 0  ;;  %s33_s26 = sshll.u32 %s3057_s1, 4  ;;  %s34_s26 = int_to_ptr.hbm [resolvable:$true] %s33_s26 }
   0x3   :  { %15 = vsyncpa [#allocation5], 0  ;;  %s2513_s27 = smov [#allocation6]   ;;  %s20_s8 = sshll.u32 %s3056_s0, 4  ;;  %s21_s8 = int_to_ptr.hbm [resolvable:$true] %s20_s8 }
   0x4   :  { %s35_s28 = sshll.u32 %s2513_s27, 4  ;;  %s2514_s9 = smov 64   ;;  %s36_s28 = int_to_ptr.vmem [resolvable:$true] %s35_s28 }
   0x5   :  { %s2515_s10 = smov 4   ;;  %s2516_s11 = smov [#allocation3]  }
   0x6   :  { %41 = dma.hbm_to_vmem [thread:$0]  %s34_s26, 1024, %s36_s28, [#allocation7], %s2514_s9, %s2514_s9, %s2515_s10  }
   0x7   :  { %s22_s12 = sshll.u32 %s2516_s11, 4  ;;  %s2517_s13 = smov 128   ;;  %s23_s12 = int_to_ptr.vmem [resolvable:$true] %s22_s12 }
   0x8   :  { %s2518_s14 = smov 8   ;;  %s46_s16 = sshll.u32 %s3058_s2, 4  ;;  %s47_s16 = int_to_ptr.hbm [resolvable:$true] %s46_s16 }
   0x9   :  { %28 = dma.hbm_to_vmem [thread:$0]  %s21_s8, 2048, %s23_s12, [#allocation4], %s2517_s13, %s2517_s13, %s2518_s14  }
   0xa   :  { %s2519_s17 = smov [#allocation8]   ;;  %s59_s20 = sshll.u32 %s3059_s3, 4  ;;  %s60_s20 = int_to_ptr.hbm [resolvable:$true] %s59_s20 }
   0xb   :  { %s48_s0 = sshll.u32 %s2519_s17, 4  ;;  %s2520_s21 = smov [#allocation9]   ;;  %s49_s0 = int_to_ptr.vmem [resolvable:$true] %s48_s0 }
   0xc   :  { %54 = dma.hbm_to_vmem [thread:$0]  %s47_s16, 9216, %s49_s0, [#allocation7], %s2514_s9, %s2514_s9, %s2515_s10  }
   0xd   :  { %s61_s22 = sshll.u32 %s2520_s21, 4  ;;  %s62_s22 = int_to_ptr.vmem [resolvable:$true] %s61_s22 }
   0xe   :  { %67 = dma.hbm_to_vmem [thread:$0]  %s60_s20, 1024, %s62_s22, [#allocation10], %s2514_s9, %s2514_s9, %s2515_s10  }
   0xf   :  { %2505 = dma.done.wait [#allocation4], 2048  }
  0x10   :  { %2506 = vsyncadd [#allocation4], 4294965248 }
  0x11   :  { %2507 = dma.done.wait [#allocation7], 10240  }
  0x12   :  { %2508 = vsyncadd [#allocation7], 4294957056 }
  0x13   :  { %2509 = dma.done.wait [#allocation10], 1024  }
  0x14   :  { %2510 = vsyncadd [#allocation10], 4294966272  ;;  %v2251_v0 = vld [vmem:[#allocation6 + $0x38] sm:$0xff]  ;;  %v2250_v1 = vld [vmem:[#allocation6 + $0x30] sm:$0xff]  ;;  %v2521_v42 = vmov 0.0   ;;  %s1877_s28 = sshll.u32 %s3063_s7, 4  ;;  %s1878_s28 = int_to_ptr.hbm [resolvable:$true] %s1877_s28 }
  0x15   :  { %182 = vmatpush.bf16.msra.mxu0 %v2251_v0  ;;  %2332 = vmatpush.bf16.msra.mxu3 %v2251_v0  ;;  %v2249_v2 = vld [vmem:[#allocation6 + $0x28] sm:$0xff]  ;;  %v2248_v3 = vld [vmem:[#allocation6 + $0x20] sm:$0xff]  ;;  %v2247_v4 = vld [vmem:[#allocation6 + $0x18] sm:$0xff]  ;;  %253 = vst [vmem:[#allocation2 + $0x10] sm:$0xff] %v2521_v42 }
  0x16   :  { %v2246_v5 = vld [vmem:[#allocation6 + $0x10] sm:$0xff]  ;;  %v2245_v6 = vld [vmem:[#allocation6 + $0x8] sm:$0xff]  ;;  %v2244_v7 = vld [vmem:[#allocation6] sm:$0xff]  ;;  %254 = vst [vmem:[#allocation2 + $0x18] sm:$0x3] %v2521_v42 }
  0x17   :  { %v90_v8 = vld [vmem:[#allocation3] sm:$0xff]  ;;  %v91_v9 = vld [vmem:[#allocation3 + $0x8] sm:$0xff]  ;;  %v92_v14 = vld [vmem:[#allocation3 + $0x10] sm:$0xff]  ;;  %251 = vst [vmem:[#allocation2] sm:$0xff] %v2521_v42 }
  0x18   :  { %v94_v10 = vld [vmem:[#allocation3 + $0x20] sm:$0xff]  ;;  %v95_v11 = vld [vmem:[#allocation3 + $0x28] sm:$0xff]  ;;  %v106_v12 = vpack.c.bf16 %v91_v9, %v90_v8  ;;  %v93_v15 = vld [vmem:[#allocation3 + $0x18] sm:$0xff]  ;;  %252 = vst [vmem:[#allocation2 + $0x8] sm:$0x3] %v2521_v42 }
  0x19   :  { %183 = vmatpush.bf16.msra.mxu0 %v2250_v1  ;;  %2333 = vmatpush.bf16.msra.mxu3 %v2250_v1  ;;  %v108_v13 = vpack.c.bf16 %v95_v11, %v94_v10  ;;  %v96_v16 = vld [vmem:[#allocation3 + $0x30] sm:$0xff]  ;;  %v97_v17 = vld [vmem:[#allocation3 + $0x38] sm:$0xff]  ;;  %v107_v18 = vpack.c.bf16 %v93_v15, %v92_v14  ;;  %v98_v20 = vld [vmem:[#allocation3 + $0x40] sm:$0xff]  ;;  %255 = vst [vmem:[#allocation2 + $0x20] sm:$0xff] %v2521_v42 }
  0x1a   :  { %v109_v19 = vpack.c.bf16 %v97_v17, %v96_v16  ;;  %v99_v21 = vld [vmem:[#allocation3 + $0x48] sm:$0xff]  ;;  %v100_v23 = vld [vmem:[#allocation3 + $0x50] sm:$0xff]  ;;  %v101_v24 = vld [vmem:[#allocation3 + $0x58] sm:$0xff]  ;;  %256 = vst [vmem:[#allocation2 + $0x28] sm:$0x3] %v2521_v42 }
  0x1b   :  { %v110_v22 = vpack.c.bf16 %v99_v21, %v98_v20  ;;  %v111_v25 = vpack.c.bf16 %v101_v24, %v100_v23  ;;  %v2267_v26 = vld [vmem:[#allocation8 + $0x78] sm:$0xff]  ;;  %v2266_v28 = vld [vmem:[#allocation8 + $0x70] sm:$0xff]  ;;  %v2265_v30 = vld [vmem:[#allocation8 + $0x68] sm:$0xff]  ;;  %257 = vst [vmem:[#allocation2 + $0x30] sm:$0xff] %v2521_v42 }
  0x1c   :  { %v2275_v27 = vld [vmem:[#allocation8 + $0xb8] sm:$0xff]  ;;  %v2274_v29 = vld [vmem:[#allocation8 + $0xb0] sm:$0xff]  ;;  %2340 = vmatpush.bf16.msra.mxu1 %v2267_v26  ;;  %v2273_v31 = vld [vmem:[#allocation8 + $0xa8] sm:$0xff]  ;;  %258 = vst [vmem:[#allocation2 + $0x38] sm:$0x3] %v2521_v42 }
  0x1d   :  { %184 = vmatpush.bf16.msra.mxu0 %v2249_v2  ;;  %2334 = vmatpush.bf16.msra.mxu3 %v2249_v2  ;;  %v102_v32 = vld [vmem:[#allocation3 + $0x60] sm:$0xff]  ;;  %v103_v33 = vld [vmem:[#allocation3 + $0x68] sm:$0xff]  ;;  %v104_v37 = vld [vmem:[#allocation3 + $0x70] sm:$0xff]  ;;  %259 = vst [vmem:[#allocation2 + $0x40] sm:$0xff] %v2521_v42 }
  0x1e   :  { %v2264_v34 = vld [vmem:[#allocation8 + $0x60] sm:$0xff]  ;;  %v112_v36 = vpack.c.bf16 %v103_v33, %v102_v32  ;;  %v105_v38 = vld [vmem:[#allocation3 + $0x78] sm:$0xff]  ;;  %v2262_v41 = vld [vmem:[#allocation8 + $0x50] sm:$0xff]  ;;  %260 = vst [vmem:[#allocation2 + $0x48] sm:$0x3] %v2521_v42 }
  0x1f   :  { %v2272_v35 = vld [vmem:[#allocation8 + $0xa0] sm:$0xff]  ;;  %v113_v39 = vpack.c.bf16 %v105_v38, %v104_v37  ;;  %v2263_v40 = vld [vmem:[#allocation8 + $0x58] sm:$0xff]  ;;  %v2261_v44 = vld [vmem:[#allocation8 + $0x48] sm:$0xff]  ;;  %261 = vst [vmem:[#allocation2 + $0x50] sm:$0xff] %v2521_v42 }
  0x20   :  { %2341 = vmatpush.bf16.msra.mxu1 %v2266_v28  ;;  %v2271_v43 = vld [vmem:[#allocation8 + $0x98] sm:$0xff]  ;;  %v2270_v45 = vld [vmem:[#allocation8 + $0x90] sm:$0xff]  ;;  %v2260_v46 = vld [vmem:[#allocation8 + $0x40] sm:$0xff]  ;;  %262 = vst [vmem:[#allocation2 + $0x58] sm:$0x3] %v2521_v42 }
  0x21   :  { %185 = vmatpush.bf16.msra.mxu0 %v2248_v3  ;;  %2335 = vmatpush.bf16.msra.mxu3 %v2248_v3  ;;  %v2259_v47 = vld [vmem:[#allocation8 + $0x38] sm:$0xff]  ;;  %v2269_v48 = vld [vmem:[#allocation8 + $0x88] sm:$0xff]  ;;  %263 = vst [vmem:[#allocation2 + $0x60] sm:$0xff] %v2521_v42  ;;  %v2258_v49 = vld [vmem:[#allocation8 + $0x30] sm:$0xff] }
  0x22   :  { %2348 = vmatpush.bf16.msra.mxu2 %v2259_v47  ;;  %264 = vst [vmem:[#allocation2 + $0x68] sm:$0x3] %v2521_v42  ;;  %v2268_v50 = vld [vmem:[#allocation8 + $0x80] sm:$0xff]  ;;  %v2257_v51 = vld [vmem:[#allocation8 + $0x28] sm:$0xff]  ;;  %v2255_v53 = vld [vmem:[#allocation8 + $0x18] sm:$0xff] }
  0x23   :  { %265 = vst [vmem:[#allocation2 + $0x70] sm:$0xff] %v2521_v42  ;;  %v2256_v52 = vld [vmem:[#allocation8 + $0x20] sm:$0xff]  ;;  %v2254_v54 = vld [vmem:[#allocation8 + $0x10] sm:$0xff]  ;;  %v2253_v56 = vld [vmem:[#allocation8 + $0x8] sm:$0xff] }
  0x24   :  { %2342 = vmatpush.bf16.msra.mxu1 %v2265_v30  ;;  %266 = vst [vmem:[#allocation2 + $0x78] sm:$0x3] %v2521_v42  ;;  %v2613_v55 = vld [vmem:[%s3060_s4] ss:$0 sm:$0xff]  ;;  %v348_v59 = vld [vmem:[#allocation2 + $0x1] sm:$0xff]  ;;  %v2283_v0 = vld [vmem:[#allocation8 + $0xf8] sm:$0xff] }
  0x25   :  { %186 = vmatpush.bf16.msra.mxu0 %v2247_v4  ;;  %2336 = vmatpush.bf16.msra.mxu3 %v2247_v4  ;;  %267 = vst [vmem:[#allocation2 + $0x80] sm:$0xff] %v2521_v42  ;;  %v2252_v60 = vld [vmem:[#allocation8] sm:$0xff]  ;;  %v2291_v2 = vld [vmem:[#allocation8 + $0x138] sm:$0xff]  ;;  %v2290_v20 = vld [vmem:[#allocation8 + $0x130] sm:$0xff] }
  0x26   :  { %2349 = vmatpush.bf16.msra.mxu2 %v2258_v49  ;;  %268 = vst [vmem:[#allocation2 + $0x88] sm:$0x3] %v2521_v42  ;;  %v2278_v33 = vld [vmem:[#allocation8 + $0xd0] sm:$0xff] }
  0x27   :  { %269 = vst [vmem:[#allocation2 + $0x90] sm:$0xff] %v2521_v42 }
  0x28   :  { %2343 = vmatpush.bf16.msra.mxu1 %v2264_v34  ;;  %270 = vst [vmem:[#allocation2 + $0x98] sm:$0x3] %v2521_v42 }
  0x29   :  { %187 = vmatpush.bf16.msra.mxu0 %v2246_v5  ;;  %2337 = vmatpush.bf16.msra.mxu3 %v2246_v5  ;;  %271 = vst [vmem:[#allocation2 + $0xa0] sm:$0xff] %v2521_v42 }
  0x2a   :  { %2350 = vmatpush.bf16.msra.mxu2 %v2257_v51  ;;  %272 = vst [vmem:[#allocation2 + $0xa8] sm:$0x3] %v2521_v42 }
  0x2b   :  { %273 = vst [vmem:[#allocation2 + $0xb0] sm:$0xff] %v2521_v42 }
  0x2c   :  { %2344 = vmatpush.bf16.msra.mxu1 %v2263_v40  ;;  %274 = vst [vmem:[#allocation2 + $0xb8] sm:$0x3] %v2521_v42 }
  0x2d   :  { %188 = vmatpush.bf16.msra.mxu0 %v2245_v6  ;;  %2338 = vmatpush.bf16.msra.mxu3 %v2245_v6  ;;  %275 = vst [vmem:[#allocation2 + $0xc0] sm:$0xff] %v2521_v42  ;;  %v583_v6 = vld [vmem:[#allocation2 + $0x2] sm:$0xff] }
  0x2e   :  { %2351 = vmatpush.bf16.msra.mxu2 %v2256_v52  ;;  %276 = vst [vmem:[#allocation2 + $0xc8] sm:$0x3] %v2521_v42 }
  0x2f   :  { %277 = vst [vmem:[#allocation2 + $0xd0] sm:$0xff] %v2521_v42 }
  0x30   :  { %2345 = vmatpush.bf16.msra.mxu1 %v2262_v41  ;;  %278 = vst [vmem:[#allocation2 + $0xd8] sm:$0x3] %v2521_v42 }
  0x31   :  { %189 = vmatpush.bf16.msra.mxu0 %v2244_v7  ;;  %2339 = vmatpush.bf16.msra.mxu3 %v2244_v7  ;;  %279 = vst [vmem:[#allocation2 + $0xe0] sm:$0xff] %v2521_v42  ;;  %v2282_v7 = vld [vmem:[#allocation8 + $0xf0] sm:$0xff] }
  0x32   :  { %2352 = vmatpush.bf16.msra.mxu2 %v2255_v53  ;;  %280 = vst [vmem:[#allocation2 + $0xe8] sm:$0x3] %v2521_v42 }
  0x33   :  { %281 = vst [vmem:[#allocation2 + $0xf0] sm:$0xff] %v2521_v42 }
  0x34   :  { %190 = vmatmul.bf16.vlgmr.msra.gmra.mxu0 %v106_v12  ;;  %200 = vmatmul.bf16.vlgmr.msra.gmra.mxu3 %v108_v13  ;;  %282 = vst [vmem:[#allocation2 + $0xf8] sm:$0x3] %v2521_v42  ;;  %v2281_v13 = vld [vmem:[#allocation8 + $0xe8] sm:$0xff] }
  0x35   :  { %437 = vmatpush.bf16.msrb.mxu0 %v2267_v26  ;;  %672 = vmatpush.bf16.msrb.mxu3 %v2275_v27  ;;  %283 = vst [vmem:[#allocation2 + $0x100] sm:$0xff] %v2521_v42  ;;  %v2279_v26 = vld [vmem:[#allocation8 + $0xd8] sm:$0xff] }
  0x36   :  { %2346 = vmatpush.bf16.msra.mxu1 %v2261_v44  ;;  %2353 = vmatpush.bf16.msra.mxu2 %v2254_v54  ;;  %284 = vst [vmem:[#allocation2 + $0x108] sm:$0x3] %v2521_v42 }
  0x37   :  { %285 = vst [vmem:[#allocation2 + $0x110] sm:$0xff] %v2521_v42 }
  0x38   :  { %286 = vst [vmem:[#allocation2 + $0x118] sm:$0x3] %v2521_v42 }
  0x39   :  { %438 = vmatpush.bf16.msrb.mxu0 %v2266_v28  ;;  %673 = vmatpush.bf16.msrb.mxu3 %v2274_v29  ;;  %287 = vst [vmem:[#allocation2 + $0x120] sm:$0xff] %v2521_v42 }
  0x3a   :  { %2347 = vmatpush.bf16.msra.mxu1 %v2260_v46  ;;  %2354 = vmatpush.bf16.msra.mxu2 %v2253_v56  ;;  %288 = vst [vmem:[#allocation2 + $0x128] sm:$0x3] %v2521_v42 }
  0x3b   :  { %289 = vst [vmem:[#allocation2 + $0x130] sm:$0xff] %v2521_v42 }
  0x3c   :  { %290 = vst [vmem:[#allocation2 + $0x138] sm:$0x3] %v2521_v42 }
  0x3d   :  { %439 = vmatpush.bf16.msrb.mxu0 %v2265_v30  ;;  %674 = vmatpush.bf16.msrb.mxu3 %v2273_v31 }
  0x3e   :  { %2355 = vmatpush.bf16.msra.mxu2 %v2252_v60  ;;  %980 = vmatpush.bf16.msrb.mxu1 %v2291_v2 }
  0x41   :  { %440 = vmatpush.bf16.msrb.mxu0 %v2264_v34  ;;  %675 = vmatpush.bf16.msrb.mxu3 %v2272_v35 }
  0x42   :  { %981 = vmatpush.bf16.msrb.mxu1 %v2290_v20 }
  0x44   :  { %195 = vmatmul.bf16.gmra.mxu0 %v107_v18  ;;  %205 = vmatmul.bf16.gmra.mxu3 %v109_v19  ;;  %v2280_v18 = vld [vmem:[#allocation8 + $0xe0] sm:$0xff] }
  0x45   :  { %441 = vmatpush.bf16.msrb.mxu0 %v2263_v40  ;;  %676 = vmatpush.bf16.msrb.mxu3 %v2271_v43 }
  0x49   :  { %442 = vmatpush.bf16.msrb.mxu0 %v2262_v41  ;;  %677 = vmatpush.bf16.msrb.mxu3 %v2270_v45  ;;  %v2277_v41 = vld [vmem:[#allocation8 + $0xc8] sm:$0xff] }
  0x4d   :  { %443 = vmatpush.bf16.msrb.mxu0 %v2261_v44  ;;  %678 = vmatpush.bf16.msrb.mxu3 %v2269_v48  ;;  %v2289_v44 = vld [vmem:[#allocation8 + $0x128] sm:$0xff]  ;;  %v2276_v48 = vld [vmem:[#allocation8 + $0xc0] sm:$0xff] }
  0x4e   :  { %982 = vmatpush.bf16.msrb.mxu1 %v2289_v44 }
  0x51   :  { %444 = vmatpush.bf16.msrb.mxu0 %v2260_v46  ;;  %679 = vmatpush.bf16.msrb.mxu3 %v2268_v50 }
  0x54   :  { %210 = vmatmul.bf16.gmra.mxu3 %v110_v22 }
  0x55   :  { %534 = vmatpush.bf16.msra.mxu0 %v2259_v47 }
  0x59   :  { %535 = vmatpush.bf16.msra.mxu0 %v2258_v49 }
  0x5d   :  { %536 = vmatpush.bf16.msra.mxu0 %v2257_v51 }
  0x61   :  { %537 = vmatpush.bf16.msra.mxu0 %v2256_v52 }
  0x64   :  { %215 = vmatmul.bf16.gmra.mxu3 %v111_v25 }
  0x65   :  { %538 = vmatpush.bf16.msra.mxu0 %v2255_v53 }
  0x69   :  { %539 = vmatpush.bf16.msra.mxu0 %v2254_v54 }
  0x6d   :  { %540 = vmatpush.bf16.msra.mxu0 %v2253_v56 }
  0x71   :  { %541 = vmatpush.bf16.msra.mxu0 %v2252_v60 }
  0x74   :  { %220 = vmatmul.bf16.gmra.mxu3 %v112_v36 }
  0x84   :  { %225 = vmatmul.bf16.gmra.mxu3 %v113_v39 }
  0xb1   :  { %v191_v57 = vpop.f32.mrf.mxu0 }
  0xb2   :  { %v192_v58 = vadd.f32 %v2613_v55, %v191_v57 }
  0xb4   :  { %v2622_v61 = vmax.f32 %v192_v58, 0.0 }
  0xb6   :  { %292 = vst [vmem:[#allocation2 + $0x11] sm:$0xff] %v2622_v61  ;;  %v364_v62 = vpack.c.bf16 %v2622_v61, %v348_v59  ;;  %v2288_v59 = vld [vmem:[#allocation8 + $0x120] sm:$0xff] }
  0xb7   :  { %v201_v63 = vpop.f32.mrf.mxu3  ;;  %983 = vmatpush.bf16.msrb.mxu1 %v2288_v59 }
  0xb8   :  { %v202_v1 = vadd.f32 %v2613_v55, %v201_v63  ;;  %445 = vmatmul.bf16.vlgmr.msrb.gmra.mxu0 %v364_v62 }
  0xb9   :  { %v193_v3 = vpop.f32.mrf.mxu0  ;;  %826 = vmatpush.bf16.msrb.mxu0 %v2283_v0 }
  0xba   :  { %v194_v4 = vadd.f32 %v2613_v55, %v193_v3  ;;  %v2630_v5 = vmax.f32 %v202_v1, 0.0 }
  0xbc   :  { %v2632_v8 = vmax.f32 %v194_v4, 0.0  ;;  %296 = vst [vmem:[#allocation2 + $0x51] sm:$0xff] %v2630_v5 }
  0xbd   :  { %v2635_v9 = vld [vmem:[#allocation2 + $0x12] sm:$0xff]  ;;  %827 = vmatpush.bf16.msrb.mxu0 %v2282_v7 }
  0xbe   :  { %293 = vst [vmem:[#allocation2 + $0x21] sm:$0xff] %v2632_v8  ;;  %v599_v10 = vpack.c.bf16 %v2635_v9, %v583_v6  ;;  %v907_v11 = vpack.c.bf16 %v2632_v8, %v2622_v61  ;;  %v2679_v47 = vld [vmem:[#allocation2 + $0x10] sm:$0xff] }
  0xbf   :  { %v203_v12 = vpop.f32.mrf.mxu3  ;;  %v324_v53 = vpack.c.bf16 %v2679_v47, %v2521_v42 }
  0xc0   :  { %680 = vmatmul.bf16.vlgmr.msrb.gmra.mxu3 %v599_v10  ;;  %v204_v14 = vadd.f32 %v2613_v55, %v203_v12 }
  0xc1   :  { %v196_v15 = vpop.f32.mrf.mxu0  ;;  %828 = vmatpush.bf16.msrb.mxu0 %v2281_v13 }
  0xc2   :  { %v197_v16 = vadd.f32 %v2613_v55, %v196_v15  ;;  %v2643_v17 = vmax.f32 %v204_v14, 0.0  ;;  %v2287_v15 = vld [vmem:[#allocation8 + $0x118] sm:$0xff] }
  0xc3   :  { %v2658_v29 = vld [vmem:[#allocation2 + $0x52] sm:$0xff]  ;;  %984 = vmatpush.bf16.msrb.mxu1 %v2287_v15  ;;  %v2296_v15 = vld [vmem:[#allocation8 + $0x160] sm:$0xff] }
  0xc4   :  { %v2645_v19 = vmax.f32 %v197_v16, 0.0  ;;  %297 = vst [vmem:[#allocation2 + $0x61] sm:$0xff] %v2643_v17  ;;  %v909_v21 = vpack.c.bf16 %v2643_v17, %v2630_v5  ;;  %v2677_v46 = vld [vmem:[#allocation2 + $0x50] sm:$0xff]  ;;  %v356_v16 = vld [vmem:[#allocation2 + $0xa1] sm:$0xff] }
  0xc5   :  { %v2650_v22 = vld [vmem:[#allocation2 + $0x22] sm:$0xff]  ;;  %829 = vmatpush.bf16.msrb.mxu0 %v2280_v18 }
  0xc6   :  { %294 = vst [vmem:[#allocation2 + $0x31] sm:$0xff] %v2645_v19  ;;  %v365_v23 = vpack.c.bf16 %v2645_v19, %v2632_v8  ;;  %v1061_v24 = vpack.c.bf16 %v2650_v22, %v2635_v9  ;;  %v310_v7 = vld [vmem:[#allocation2 + $0x20] sm:$0xff] }
  0xc7   :  { %v206_v25 = vpop.f32.mrf.mxu3  ;;  %v2312_v8 = vld [vmem:[#allocation8 + $0x1e0] sm:$0xff] }
  0xc8   :  { %v207_v27 = vadd.f32 %v2613_v55, %v206_v25  ;;  %450 = vmatmul.bf16.gmra.mxu0 %v365_v23  ;;  %v2320_v9 = vld [vmem:[#allocation8 + $0x220] sm:$0xff] }
  0xc9   :  { %v198_v28 = vpop.f32.mrf.mxu0  ;;  %830 = vmatpush.bf16.msrb.mxu0 %v2279_v26 }
  0xca   :  { %v199_v30 = vadd.f32 %v2613_v55, %v198_v28  ;;  %v237_v31 = vmax.f32 %v207_v27, 0.0 }
  0xcb   :  { %v2661_v32 = vld [vmem:[#allocation2 + $0x62] sm:$0xff] }
  0xcc   :  { %v2663_v34 = vmax.f32 %v199_v30, 0.0  ;;  %298 = vst [vmem:[#allocation2 + $0x71] sm:$0xff] %v237_v31  ;;  %v1063_v35 = vpack.c.bf16 %v2661_v32, %v2658_v29  ;;  %v367_v62 = vpack.c.bf16 %v237_v31, %v2643_v17  ;;  %v2706_v2 = vld [vmem:[#allocation2 + $0x60] sm:$0xff] }
  0xcd   :  { %v2667_v36 = vld [vmem:[#allocation2 + $0x32] sm:$0xff]  ;;  %831 = vmatpush.bf16.msrb.mxu0 %v2278_v33 }
  0xce   :  { %295 = vst [vmem:[#allocation2 + $0x41] sm:$0xff] %v2663_v34  ;;  %v600_v37 = vpack.c.bf16 %v2667_v36, %v2650_v22  ;;  %v366_v38 = vpack.c.bf16 %v2630_v5, %v2663_v34  ;;  %v908_v39 = vpack.c.bf16 %v2663_v34, %v2645_v19  ;;  %v2710_v4 = vld [vmem:[#allocation2 + $0x30] sm:$0xff] }
  0xcf   :  { %v208_v40 = vpop.f32.mrf.mxu3  ;;  %v2720_v12 = vpack.c.bf16 %v2710_v4, %v310_v7  ;;  %v2286_v33 = vld [vmem:[#allocation8 + $0x110] sm:$0xff] }
  0xd0   :  { %685 = vmatmul.bf16.gmra.mxu3 %v600_v37  ;;  %v209_v43 = vadd.f32 %v2613_v55, %v208_v40  ;;  %455 = vmatmul.bf16.vlgmr.msra.gmra.mxu1 %v366_v38 }
  0xd1   :  { %832 = vmatpush.bf16.msrb.mxu0 %v2277_v41  ;;  %985 = vmatpush.bf16.msrb.mxu1 %v2286_v33 }
  0xd2   :  { %v238_v45 = vmax.f32 %v209_v43, 0.0  ;;  %v753_v43 = vpack.c.bf16 %v310_v7, %v2679_v47  ;;  %v2307_v7 = vld [vmem:[#allocation8 + $0x1b8] sm:$0xff] }
  0xd3   :  { %v2708_v3 = vld [vmem:[#allocation2 + $0x70] sm:$0xff]  ;;  %1289 = vmatpush.bf16.msra.mxu3 %v2307_v7 }
  0xd4   :  { %299 = vst [vmem:[#allocation2 + $0x81] sm:$0xff] %v238_v45  ;;  %v2681_v49 = vpack.c.bf16 %v238_v45, %v237_v31  ;;  %v2717_v10 = vpack.c.bf16 %v2708_v3, %v2706_v2  ;;  %v2729_v23 = vld [vmem:[#allocation2 + $0x72] sm:$0xff] }
  0xd5   :  { %v2683_v50 = vld [vmem:[#allocation2 + $0x40] sm:$0xff]  ;;  %833 = vmatpush.bf16.msrb.mxu0 %v2276_v48  ;;  %v602_v28 = vpack.c.bf16 %v2729_v23, %v2661_v32  ;;  %v2299_v45 = vld [vmem:[#allocation8 + $0x178] sm:$0xff] }
  0xd6   :  { %v2685_v51 = vld [vmem:[#allocation2 + $0x42] sm:$0xff]  ;;  %v2689_v52 = vpack.c.bf16 %v2677_v46, %v2683_v50  ;;  %1134 = vmatpush.bf16.msrb.mxu2 %v2299_v45 }
  0xd7   :  { %v1062_v54 = vpack.c.bf16 %v2685_v51, %v2667_v36  ;;  %v211_v56 = vpop.f32.mrf.mxu3  ;;  %v601_v60 = vpack.c.bf16 %v2658_v29, %v2685_v51  ;;  %v2305_v45 = vld [vmem:[#allocation8 + $0x1a8] sm:$0xff]  ;;  %v2308_v36 = vld [vmem:[#allocation8 + $0x1c0] sm:$0xff] }
  0xd8   :  { %552 = vmatmul.bf16.vlgmr.msra.gmra.mxu2 %v2689_v52  ;;  %v212_v57 = vadd.f32 %v2613_v55, %v211_v56  ;;  %542 = vmatmul.bf16.vlgmr.msra.gmra.mxu0 %v324_v53  ;;  %v2298_v53 = vld [vmem:[#allocation8 + $0x170] sm:$0xff] }
  0xda   :  { %v2697_v58 = vmax.f32 %v212_v57, 0.0  ;;  %v591_v57 = vld [vmem:[#allocation2 + $0xa2] sm:$0xff]  ;;  %1135 = vmatpush.bf16.msrb.mxu2 %v2298_v53 }
  0xdb   :  { %v2284_v53 = vld [vmem:[#allocation8 + $0x100] sm:$0xff] }
  0xdc   :  { %300 = vst [vmem:[#allocation2 + $0xb1] sm:$0xff] %v2697_v58  ;;  %v368_v26 = vpack.c.bf16 %v2697_v58, %v356_v16  ;;  %v2306_v16 = vld [vmem:[#allocation8 + $0x1b0] sm:$0xff] }
  0xdd   :  { %1290 = vmatpush.bf16.msra.mxu3 %v2306_v16 }
  0xdf   :  { %v213_v63 = vpop.f32.mrf.mxu3 }
  0xe0   :  { %690 = vmatmul.bf16.gmra.mxu3 %v601_v60  ;;  %v214_v0 = vadd.f32 %v2613_v55, %v213_v63  ;;  %460 = vmatmul.bf16.gmra.mxu1 %v367_v62 }
  0xe1   :  { %1291 = vmatpush.bf16.msra.mxu3 %v2305_v45 }
  0xe2   :  { %v2704_v1 = vmax.f32 %v214_v0, 0.0  ;;  %v2297_v0 = vld [vmem:[#allocation8 + $0x168] sm:$0xff] }
  0xe3   :  { %v2725_v18 = vld [vmem:[#allocation2 + $0xb2] sm:$0xff]  ;;  %1136 = vmatpush.bf16.msrb.mxu2 %v2297_v0 }
  0xe4   :  { %301 = vst [vmem:[#allocation2 + $0xc1] sm:$0xff] %v2704_v1  ;;  %v911_v6 = vpack.c.bf16 %v2704_v1, %v2697_v58  ;;  %v2740_v37 = vld [vmem:[#allocation2 + $0xb0] sm:$0xff]  ;;  %v603_v47 = vpack.c.bf16 %v2725_v18, %v591_v57  ;;  %v2317_v58 = vld [vmem:[#allocation8 + $0x208] sm:$0xff] }
  0xe5   :  { %v328_v40 = vpack.c.bf16 %v2740_v37, %v2521_v42  ;;  %v2294_v57 = vld [vmem:[#allocation8 + $0x150] sm:$0xff] }
  0xe7   :  { %v216_v13 = vpop.f32.mrf.mxu3  ;;  %1137 = vmatpush.bf16.msrb.mxu2 %v2296_v15  ;;  %v2303_v15 = vld [vmem:[#allocation8 + $0x198] sm:$0xff] }
  0xe8   :  { %557 = vmatmul.bf16.gmra.mxu2 %v2717_v10  ;;  %v217_v14 = vadd.f32 %v2613_v55, %v216_v13  ;;  %547 = vmatmul.bf16.gmra.mxu0 %v2720_v12 }
  0xea   :  { %v2727_v20 = vmax.f32 %v217_v14, 0.0  ;;  %v2285_v14 = vld [vmem:[#allocation8 + $0x108] sm:$0xff] }
  0xeb   :  { %v2731_v25 = vld [vmem:[#allocation2 + $0xc2] sm:$0xff]  ;;  %986 = vmatpush.bf16.msrb.mxu1 %v2285_v14 }
  0xec   :  { %302 = vst [vmem:[#allocation2 + $0xd1] sm:$0xff] %v2727_v20  ;;  %v1065_v27 = vpack.c.bf16 %v2731_v25, %v2725_v18  ;;  %v369_v62 = vpack.c.bf16 %v2727_v20, %v2704_v1  ;;  %v2293_v14 = vld [vmem:[#allocation8 + $0x148] sm:$0xff] }
  0xef   :  { %v218_v30 = vpop.f32.mrf.mxu3  ;;  %987 = vmatpush.bf16.msrb.mxu1 %v2284_v53 }
  0xf0   :  { %695 = vmatmul.bf16.gmra.mxu3 %v602_v28  ;;  %v219_v31 = vadd.f32 %v2613_v55, %v218_v30  ;;  %465 = vmatmul.bf16.gmra.mxu1 %v368_v26  ;;  %v2766_v28 = vld [vmem:[#allocation2 + $0xc0] sm:$0xff] }
  0xf2   :  { %v2742_v38 = vmax.f32 %v219_v31, 0.0 }
  0xf3   :  { %v2753_v59 = vld [vmem:[#allocation2 + $0xd2] sm:$0xff] }
  0xf4   :  { %303 = vst [vmem:[#allocation2 + $0xe1] sm:$0xff] %v2742_v38  ;;  %v912_v41 = vpack.c.bf16 %v2742_v38, %v2727_v20  ;;  %v2768_v30 = vld [vmem:[#allocation2 + $0xd0] sm:$0xff] }
  0xf5   :  { %v2775_v33 = vpack.c.bf16 %v2768_v30, %v2766_v28 }
  0xf7   :  { %v221_v44 = vpop.f32.mrf.mxu3 }
  0xf8   :  { %562 = vmatmul.bf16.gmra.mxu2 %v328_v40  ;;  %v222_v48 = vadd.f32 %v2613_v55, %v221_v44  ;;  %834 = vmatmul.bf16.vlgmr.msrb.gmra.mxu0 %v753_v43  ;;  %v754_v40 = vpack.c.bf16 %v2683_v50, %v2710_v4  ;;  %v2295_v44 = vld [vmem:[#allocation8 + $0x158] sm:$0xff]  ;;  %v604_v4 = vpack.c.bf16 %v2753_v59, %v2731_v25 }
  0xf9   :  { %1138 = vmatpush.bf16.msrb.mxu2 %v2295_v44  ;;  %v2302_v44 = vld [vmem:[#allocation8 + $0x190] sm:$0xff] }
  0xfa   :  { %v2751_v56 = vmax.f32 %v222_v48, 0.0  ;;  %v1357_v25 = vld [vmem:[#allocation2 + $0x51] sm:$0xff] }
  0xfb   :  { %v2755_v60 = vld [vmem:[#allocation2 + $0xe2] sm:$0xff] }
  0xfc   :  { %304 = vst [vmem:[#allocation2 + $0xf1] sm:$0xff] %v2751_v56  ;;  %v1066_v42 = vpack.c.bf16 %v2755_v60, %v2753_v59  ;;  %v2794_v7 = vpack.c.bf16 %v2751_v56, %v2742_v38 }
  0xfd   :  { %1139 = vmatpush.bf16.msrb.mxu2 %v2294_v57 }
  0xff   :  { %v223_v63 = vpop.f32.mrf.mxu3 }
 0x100   :  { %700 = vmatmul.bf16.gmra.mxu3 %v603_v47  ;;  %v224_v13 = vadd.f32 %v2613_v55, %v223_v63  ;;  %470 = vmatmul.bf16.gmra.mxu1 %v369_v62  ;;  %v2304_v47 = vld [vmem:[#allocation8 + $0x1a0] sm:$0xff] }
 0x101   :  { %1292 = vmatpush.bf16.msra.mxu3 %v2304_v47  ;;  %1140 = vmatpush.bf16.msrb.mxu2 %v2293_v14  ;;  %v755_v47 = vpack.c.bf16 %v2706_v2, %v2677_v46  ;;  %v2300_v14 = vld [vmem:[#allocation8 + $0x180] sm:$0xff] }
 0x102   :  { %v2764_v26 = vmax.f32 %v224_v13, 0.0  ;;  %v2821_v46 = vld [vmem:[#allocation2 + $0x80] sm:$0xff] }
 0x103   :  { %v2783_v63 = vld [vmem:[#allocation2 + $0xf2] sm:$0xff] }
 0x104   :  { %305 = vst [vmem:[#allocation2 + $0x101] sm:$0xff] %v2764_v26  ;;  %v913_v31 = vpack.c.bf16 %v2764_v26, %v2751_v56  ;;  %v2800_v53 = vld [vmem:[#allocation2 + $0xf0] sm:$0xff] }
 0x105   :  { %1293 = vmatpush.bf16.msra.mxu3 %v2303_v15  ;;  %v2813_v15 = vpack.c.bf16 %v2783_v63, %v2755_v60  ;;  %v1358_v60 = vld [vmem:[#allocation2 + $0x61] sm:$0xff] }
 0x107   :  { %v226_v43 = vpop.f32.mrf.mxu3 }
 0x108   :  { %567 = vmatmul.bf16.gmra.mxu2 %v2775_v33  ;;  %v227_v48 = vadd.f32 %v2613_v55, %v226_v43  ;;  %839 = vmatmul.bf16.gmra.mxu0 %v754_v40  ;;  %v2315_v40 = vld [vmem:[#allocation8 + $0x1f8] sm:$0xff]  ;;  %v2292_v43 = vld [vmem:[#allocation8 + $0x140] sm:$0xff] }
 0x109   :  { %1443 = vmatpush.bf16.msra.mxu0 %v2315_v40  ;;  %1141 = vmatpush.bf16.msrb.mxu2 %v2292_v43  ;;  %v2314_v43 = vld [vmem:[#allocation8 + $0x1f0] sm:$0xff] }
 0x10a   :  { %v2781_v62 = vmax.f32 %v227_v48, 0.0  ;;  %v320_v48 = vld [vmem:[#allocation2 + $0xe0] sm:$0xff]  ;;  %1294 = vmatpush.bf16.msra.mxu3 %v2302_v44 }
 0x10b   :  { %v2785_v0 = vld [vmem:[#allocation2 + $0x102] sm:$0xff] }
 0x10c   :  { %306 = vst [vmem:[#allocation2 + $0x111] sm:$0xff] %v2781_v62  ;;  %v1067_v50 = vpack.c.bf16 %v2785_v0, %v2783_v63  ;;  %v322_v2 = vld [vmem:[#allocation2 + $0x100] sm:$0xff] }
 0x10d   :  { %1444 = vmatpush.bf16.msra.mxu0 %v2314_v43  ;;  %v2313_v43 = vld [vmem:[#allocation8 + $0x1e8] sm:$0xff] }
 0x10f   :  { %v228_v13 = vpop.f32.mrf.mxu3 }
 0x110   :  { %705 = vmatmul.bf16.gmra.mxu3 %v604_v4  ;;  %475 = vmatmul.bf16.gmra.mxu1 %v2794_v7  ;;  %v229_v16 = vadd.f32 %v2613_v55, %v228_v13  ;;  %v2806_v55 = vpack.c.bf16 %v2800_v53, %v320_v48  ;;  %v2301_v4 = vld [vmem:[#allocation8 + $0x188] sm:$0xff]  ;;  %v2323_v13 = vld [vmem:[#allocation8 + $0x238] sm:$0xff] }
 0x111   :  { %1295 = vmatpush.bf16.msra.mxu3 %v2301_v4  ;;  %1597 = vmatpush.bf16.msra.mxu1 %v2323_v13  ;;  %v2322_v4 = vld [vmem:[#allocation8 + $0x230] sm:$0xff] }
 0x112   :  { %v2798_v45 = vmax.f32 %v229_v16, 0.0  ;;  %v2817_v16 = vpack.c.bf16 %v2781_v62, %v2764_v26  ;;  %1445 = vmatpush.bf16.msra.mxu0 %v2313_v43 }
 0x113   :  { %v2823_v40 = vld [vmem:[#allocation2 + $0x110] sm:$0xff] }
 0x114   :  { %307 = vst [vmem:[#allocation2 + $0x121] sm:$0xff] %v2798_v45  ;;  %v2826_v44 = vpack.c.bf16 %v2823_v40, %v322_v2  ;;  %v2831_v13 = vld [vmem:[#allocation2 + $0x112] sm:$0xff] }
 0x115   :  { %1296 = vmatpush.bf16.msra.mxu3 %v2300_v14  ;;  %1598 = vmatpush.bf16.msra.mxu1 %v2322_v4  ;;  %v2835_v14 = vpack.c.bf16 %v2831_v13, %v2785_v0 }
 0x116   :  { %1446 = vmatpush.bf16.msra.mxu0 %v2312_v8 }
 0x118   :  { %572 = vmatmul.bf16.gmra.mxu2 %v2806_v55  ;;  %844 = vmatmul.bf16.gmra.mxu0 %v755_v47  ;;  %v756_v47 = vpack.c.bf16 %v2821_v46, %v2708_v3  ;;  %v757_v3 = vpack.c.bf16 %v2766_v28, %v2740_v37  ;;  %v758_v37 = vpack.c.bf16 %v320_v48, %v2768_v30  ;;  %v2311_v28 = vld [vmem:[#allocation8 + $0x1d8] sm:$0xff] }
 0x11a   :  { %1447 = vmatpush.bf16.msra.mxu0 %v2311_v28 }
 0x11b   :  { %v2866_v29 = vld [vmem:[#allocation2 + $0x120] sm:$0xff] }
 0x120   :  { %710 = vmatmul.bf16.gmra.mxu3 %v2813_v15  ;;  %480 = vmatmul.bf16.gmra.mxu1 %v2817_v16 }
 0x128   :  { %577 = vmatmul.bf16.gmra.mxu2 %v2826_v44  ;;  %849 = vmatmul.bf16.gmra.mxu0 %v756_v47  ;;  %v2321_v47 = vld [vmem:[#allocation8 + $0x228] sm:$0xff] }
 0x129   :  { %1599 = vmatpush.bf16.msra.mxu1 %v2321_v47  ;;  %v2319_v47 = vld [vmem:[#allocation8 + $0x218] sm:$0xff] }
 0x12d   :  { %1600 = vmatpush.bf16.msra.mxu1 %v2320_v9  ;;  %v2864_v9 = vld [vmem:[#allocation2 + $0x82] sm:$0xff] }
 0x130   :  { %715 = vmatmul.bf16.gmra.mxu3 %v2835_v14  ;;  %988 = vmatmul.bf16.vlgmr.msrb.gmra.mxu1 %v907_v11 }
 0x131   :  { %1601 = vmatpush.bf16.msra.mxu1 %v2319_v47  ;;  %v1219_v47 = vpack.c.bf16 0.0, %v2821_v46 }
 0x135   :  { %v446_v57 = vpop.f32.mrf.mxu0 }
 0x138   :  { %1142 = vmatmul.bf16.vlgmr.msrb.gmra.mxu2 %v1061_v24  ;;  %854 = vmatmul.bf16.gmra.mxu0 %v757_v3  ;;  %v2310_v24 = vld [vmem:[#allocation8 + $0x1d0] sm:$0xff]  ;;  %v759_v3 = vpack.c.bf16 %v322_v2, %v2800_v53 }
 0x139   :  { %1448 = vmatpush.bf16.msra.mxu0 %v2310_v24 }
 0x13d   :  { %v448_v4 = vpop.f32.mrf.mxu0 }
 0x140   :  { %1297 = vmatmul.bf16.vlgmr.msra.gmra.mxu3 %v2720_v12  ;;  %993 = vmatmul.bf16.gmra.mxu1 %v908_v39  ;;  %v2309_v39 = vld [vmem:[#allocation8 + $0x1c8] sm:$0xff] }
 0x141   :  { %1449 = vmatpush.bf16.msra.mxu0 %v2309_v39 }
 0x143   :  { %v681_v61 = vpop.f32.mrf.mxu3 }
 0x145   :  { %v451_v11 = vpop.f32.mrf.mxu0  ;;  %1450 = vmatpush.bf16.msra.mxu0 %v2308_v36 }
 0x148   :  { %1147 = vmatmul.bf16.gmra.mxu2 %v1062_v54  ;;  %859 = vmatmul.bf16.gmra.mxu0 %v758_v37 }
 0x14b   :  { %v683_v22 = vpop.f32.mrf.mxu3 }
 0x14d   :  { %v453_v12 = vpop.f32.mrf.mxu0  ;;  %v456_v43 = vpop.f32.mrf.mxu1 }
 0x150   :  { %1302 = vmatmul.bf16.gmra.mxu3 %v2689_v52  ;;  %998 = vmatmul.bf16.gmra.mxu1 %v909_v21 }
 0x153   :  { %v686_v30 = vpop.f32.mrf.mxu3 }
 0x155   :  { %v458_v51 = vpop.f32.mrf.mxu1  ;;  %v543_v54 = vpop.f32.mrf.mxu0 }
 0x156   :  { %v544_v48 = vadd.f32 %v543_v54, %v446_v57 }
 0x158   :  { %1152 = vmatmul.bf16.gmra.mxu2 %v1063_v35  ;;  %864 = vmatmul.bf16.gmra.mxu0 %v759_v3  ;;  %v721_v52 = vadd.f32 %v681_v61, %v544_v48 }
 0x15b   :  { %v553_v8 = vpop.f32.mrf.mxu2  ;;  %v688_v5 = vpop.f32.mrf.mxu3 }
 0x15c   :  { %v554_v17 = vadd.f32 %v553_v8, %v456_v43  ;;  %v1064_v43 = vpack.c.bf16 %v2864_v9, %v2729_v23 }
 0x15d   :  { %v461_v21 = vpop.f32.mrf.mxu1  ;;  %v545_v37 = vpop.f32.mrf.mxu0 }
 0x15e   :  { %v546_v28 = vadd.f32 %v545_v37, %v448_v4 }
 0x160   :  { %1307 = vmatmul.bf16.gmra.mxu3 %v2717_v10  ;;  %1003 = vmatmul.bf16.gmra.mxu1 %v2681_v49  ;;  %v722_v57 = vadd.f32 %v683_v22, %v546_v28  ;;  %v760_v10 = vpack.c.bf16 %v2866_v29, %v2823_v40  ;;  %v2318_v49 = vld [vmem:[#allocation8 + $0x210] sm:$0xff] }
 0x161   :  { %1602 = vmatpush.bf16.msra.mxu1 %v2318_v49 }
 0x163   :  { %v555_v53 = vpop.f32.mrf.mxu2  ;;  %v691_v2 = vpop.f32.mrf.mxu3 }
 0x164   :  { %v556_v32 = vadd.f32 %v555_v53, %v458_v51  ;;  %v2868_v35 = vadd.f32 %v691_v2, %v554_v17 }
 0x165   :  { %v463_v61 = vpop.f32.mrf.mxu1  ;;  %v548_v24 = vpop.f32.mrf.mxu0  ;;  %1603 = vmatpush.bf16.msra.mxu1 %v2317_v58 }
 0x166   :  { %v549_v4 = vadd.f32 %v548_v24, %v451_v11 }
 0x168   :  { %1157 = vmatmul.bf16.gmra.mxu2 %v1064_v43  ;;  %869 = vmatmul.bf16.gmra.mxu0 %v760_v10  ;;  %v723_v22 = vadd.f32 %v686_v30, %v549_v4  ;;  %v1354_v30 = vld [vmem:[#allocation2 + $0x21] sm:$0xff]  ;;  %v1371_v4 = vpack.c.bf16 %v1357_v25, %v2663_v34 }
 0x169   :  { %v1370_v2 = vpack.c.bf16 %v2645_v19, %v1354_v30 }
 0x16b   :  { %v558_v39 = vpop.f32.mrf.mxu2  ;;  %v693_v36 = vpop.f32.mrf.mxu3 }
 0x16c   :  { %v559_v54 = vadd.f32 %v558_v39, %v461_v21  ;;  %v2874_v51 = vadd.f32 %v693_v36, %v556_v32 }
 0x16d   :  { %v466_v48 = vpop.f32.mrf.mxu1  ;;  %v550_v3 = vpop.f32.mrf.mxu0 }
 0x16e   :  { %v551_v8 = vadd.f32 %v550_v3, %v453_v12 }
 0x170   :  { %1312 = vmatmul.bf16.gmra.mxu3 %v1219_v47  ;;  %1008 = vmatmul.bf16.gmra.mxu1 %v911_v6  ;;  %v724_v23 = vadd.f32 %v688_v5, %v551_v8 }
 0x173   :  { %v560_v40 = vpop.f32.mrf.mxu2  ;;  %v696_v11 = vpop.f32.mrf.mxu3 }
 0x174   :  { %v561_v17 = vadd.f32 %v560_v40, %v463_v61  ;;  %v2880_v37 = vadd.f32 %v696_v11, %v559_v54 }
 0x175   :  { %v468_v21 = vpop.f32.mrf.mxu1  ;;  %v835_v28 = vpop.f32.mrf.mxu0 }
 0x176   :  { %v2882_v53 = vadd.f32 %v835_v28, %v721_v52 }
 0x178   :  { %1162 = vmatmul.bf16.gmra.mxu2 %v1065_v27  ;;  %1451 = vmatmul.bf16.vlgmr.msra.gmra.mxu0 %v1370_v2  ;;  %v2331_v2 = vld [vmem:[#allocation9 + $0x38] sm:$0xff] }
 0x179   :  { %1774 = vmatpush.bf16.msra.mxu2 %v2331_v2  ;;  %v2328_v2 = vld [vmem:[#allocation9 + $0x20] sm:$0xff] }
 0x17b   :  { %v563_v1 = vpop.f32.mrf.mxu2  ;;  %v698_v6 = vpop.f32.mrf.mxu3 }
 0x17c   :  { %v564_v46 = vadd.f32 %v563_v1, %v466_v48  ;;  %v2888_v12 = vadd.f32 %v698_v6, %v561_v17  ;;  %v1360_v17 = vld [vmem:[#allocation2 + $0x81] sm:$0xff] }
 0x17d   :  { %v471_v5 = vpop.f32.mrf.mxu1  ;;  %v837_v32 = vpop.f32.mrf.mxu0 }
 0x17e   :  { %v2890_v61 = vadd.f32 %v837_v32, %v722_v57  ;;  %v1509_v32 = vld [vmem:[#allocation2 + $0x32] sm:$0xff] }
 0x180   :  { %1317 = vmatmul.bf16.gmra.mxu3 %v2775_v33  ;;  %1013 = vmatmul.bf16.gmra.mxu1 %v912_v41  ;;  %v2316_v33 = vld [vmem:[#allocation8 + $0x200] sm:$0xff] }
 0x181   :  { %1604 = vmatpush.bf16.msra.mxu1 %v2316_v33 }
 0x183   :  { %v565_v19 = vpop.f32.mrf.mxu2  ;;  %v701_v18 = vpop.f32.mrf.mxu3 }
 0x184   :  { %v2896_v27 = vadd.f32 %v701_v18, %v564_v46  ;;  %v566_v57 = vadd.f32 %v565_v19, %v468_v21  ;;  %v1361_v21 = vld [vmem:[#allocation2 + $0x91] sm:$0xff] }
 0x185   :  { %v473_v52 = vpop.f32.mrf.mxu1  ;;  %v840_v24 = vpop.f32.mrf.mxu0  ;;  %v1373_v6 = vpack.c.bf16 %v1361_v21, %v1360_v17 }
 0x186   :  { %v2898_v43 = vadd.f32 %v840_v24, %v723_v22  ;;  %v1508_v24 = vld [vmem:[#allocation2 + $0x22] sm:$0xff] }
 0x187   :  { %v1524_v33 = vpack.c.bf16 %v1509_v32, %v1508_v24 }
 0x188   :  { %1167 = vmatmul.bf16.gmra.mxu2 %v1066_v42  ;;  %1456 = vmatmul.bf16.gmra.mxu0 %v1371_v4  ;;  %v1359_v42 = vld [vmem:[#allocation2 + $0x71] sm:$0xff]  ;;  %v1223_v4 = vpack.c.bf16 0.0, %v2866_v29 }
 0x189   :  { %v1372_v8 = vpack.c.bf16 %v1359_v42, %v1358_v60  ;;  %v1510_v42 = vld [vmem:[#allocation2 + $0x42] sm:$0xff] }
 0x18b   :  { %v568_v38 = vpop.f32.mrf.mxu2  ;;  %v703_v41 = vpop.f32.mrf.mxu3 }
 0x18c   :  { %v569_v10 = vadd.f32 %v568_v38, %v471_v5  ;;  %v2904_v49 = vadd.f32 %v703_v41, %v566_v57  ;;  %v1362_v38 = vld [vmem:[#allocation2 + $0xc1] sm:$0xff] }
 0x18d   :  { %v476_v39 = vpop.f32.mrf.mxu1  ;;  %v842_v36 = vpop.f32.mrf.mxu0  ;;  %v1374_v29 = vpack.c.bf16 %v2727_v20, %v1362_v38 }
 0x18e   :  { %v2906_v54 = vadd.f32 %v842_v36, %v724_v23 }
 0x190   :  { %1322 = vmatmul.bf16.gmra.mxu3 %v2806_v55  ;;  %1018 = vmatmul.bf16.gmra.mxu1 %v913_v31 }
 0x193   :  { %v570_v34 = vpop.f32.mrf.mxu2  ;;  %v706_v59 = vpop.f32.mrf.mxu3 }
 0x194   :  { %v2912_v22 = vadd.f32 %v706_v59, %v569_v10  ;;  %v571_v55 = vadd.f32 %v570_v34, %v473_v52  ;;  %v2330_v10 = vld [vmem:[#allocation9 + $0x30] sm:$0xff] }
 0x195   :  { %v478_v48 = vpop.f32.mrf.mxu1  ;;  %v845_v3 = vpop.f32.mrf.mxu0  ;;  %1775 = vmatpush.bf16.msra.mxu2 %v2330_v10 }
 0x196   :  { %v2915_v47 = vadd.f32 %v845_v3, %v2868_v35  ;;  %v3064_v35 = vpack.c.bf16 %v2798_v45, %v2781_v62 }
 0x198   :  { %1172 = vmatmul.bf16.gmra.mxu2 %v1067_v50  ;;  %1461 = vmatmul.bf16.gmra.mxu0 %v1372_v8  ;;  %v2929_v50 = vld [vmem:[#allocation2 + $0x122] sm:$0xff] }
 0x19b   :  { %v573_v56 = vpop.f32.mrf.mxu2  ;;  %v708_v26 = vpop.f32.mrf.mxu3 }
 0x19c   :  { %v574_v31 = vadd.f32 %v573_v56, %v476_v39  ;;  %v2920_v23 = vadd.f32 %v708_v26, %v571_v55 }
 0x19d   :  { %v481_v40 = vpop.f32.mrf.mxu1  ;;  %v847_v11 = vpop.f32.mrf.mxu0 }
 0x19e   :  { %v2923_v30 = vadd.f32 %v847_v11, %v2874_v51  ;;  %v1068_v51 = vpack.c.bf16 %v2929_v50, %v2831_v13 }
 0x1a0   :  { %1327 = vmatmul.bf16.gmra.mxu3 %v2826_v44  ;;  %1023 = vmatmul.bf16.gmra.mxu1 %v3064_v35  ;;  %v1512_v35 = vld [vmem:[#allocation2 + $0x62] sm:$0xff] }
 0x1a3   :  { %v575_v63 = vpop.f32.mrf.mxu2  ;;  %v711_v0 = vpop.f32.mrf.mxu3 }
 0x1a4   :  { %v2931_v28 = vadd.f32 %v711_v0, %v574_v31  ;;  %v576_v62 = vadd.f32 %v575_v63, %v478_v48  ;;  %v1511_v48 = vld [vmem:[#allocation2 + $0x52] sm:$0xff] }
 0x1a5   :  { %v483_v58 = vpop.f32.mrf.mxu1  ;;  %v850_v1 = vpop.f32.mrf.mxu0  ;;  %v1513_v63 = vld [vmem:[#allocation2 + $0x72] sm:$0xff] }
 0x1a6   :  { %v2936_v44 = vadd.f32 %v850_v1, %v2880_v37  ;;  %v1526_v21 = vpack.c.bf16 %v1513_v63, %v1512_v35 }
 0x1a8   :  { %1177 = vmatmul.bf16.gmra.mxu2 %v1068_v51  ;;  %1466 = vmatmul.bf16.gmra.mxu0 %v1373_v6 }
 0x1ab   :  { %v578_v46 = vpop.f32.mrf.mxu2  ;;  %v713_v5 = vpop.f32.mrf.mxu3 }
 0x1ac   :  { %v579_v19 = vadd.f32 %v578_v46, %v481_v40  ;;  %v734_v18 = vadd.f32 %v713_v5, %v576_v62  ;;  %v1369_v46 = vld [vmem:[#allocation2 + $0x131] sm:$0xff] }
 0x1ad   :  { %v852_v25 = vpop.f32.mrf.mxu0  ;;  %v989_v52 = vpop.f32.mrf.mxu1  ;;  %v2327_v5 = vld [vmem:[#allocation9 + $0x18] sm:$0xff] }
 0x1ae   :  { %v882_v13 = vadd.f32 %v852_v25, %v2888_v12  ;;  %v2941_v37 = vadd.f32 %v989_v52, %v2882_v53  ;;  %v1377_v25 = vpack.c.bf16 %v1369_v46, %v2798_v45  ;;  %v1517_v52 = vld [vmem:[#allocation2 + $0xd2] sm:$0xff]  ;;  %v2325_v45 = vld [vmem:[#allocation9 + $0x8] sm:$0xff] }
 0x1b0   :  { %1332 = vmatmul.bf16.gmra.mxu3 %v1223_v4  ;;  %1605 = vmatmul.bf16.vlgmr.msra.gmra.mxu1 %v1524_v33  ;;  %v2326_v33 = vld [vmem:[#allocation9 + $0x10] sm:$0xff] }
 0x1b3   :  { %v716_v57 = vpop.f32.mrf.mxu3  ;;  %v580_v12 = vpop.f32.mrf.mxu2 }
 0x1b4   :  { %v735_v41 = vadd.f32 %v716_v57, %v579_v19  ;;  %v581_v53 = vadd.f32 %v580_v12, %v483_v58 }
 0x1b5   :  { %v855_v39 = vpop.f32.mrf.mxu0  ;;  %v991_v36 = vpop.f32.mrf.mxu1 }
 0x1b6   :  { %v883_v34 = vadd.f32 %v855_v39, %v2896_v27  ;;  %v2945_v59 = vadd.f32 %v991_v36, %v2890_v61  ;;  %v1525_v27 = vpack.c.bf16 %v1511_v48, %v1510_v42  ;;  %v2329_v61 = vld [vmem:[#allocation9 + $0x28] sm:$0xff]  ;;  %v2324_v48 = vld [vmem:[#allocation9] sm:$0xff] }
 0x1b7   :  { %1776 = vmatpush.bf16.msra.mxu2 %v2329_v61 }
 0x1b8   :  { %1471 = vmatmul.bf16.gmra.mxu0 %v1374_v29 }
 0x1bb   :  { %v718_v60 = vpop.f32.mrf.mxu3  ;;  %1777 = vmatpush.bf16.msra.mxu2 %v2328_v2  ;;  %v1143_v36 = vpop.f32.mrf.mxu2 }
 0x1bc   :  { %v736_v3 = vadd.f32 %v718_v60, %v581_v53 }
 0x1bd   :  { %v857_v8 = vpop.f32.mrf.mxu0  ;;  %v994_v55 = vpop.f32.mrf.mxu1 }
 0x1be   :  { %v884_v56 = vadd.f32 %v857_v8, %v2904_v49  ;;  %v2950_v26 = vadd.f32 %v994_v55, %v2898_v43 }
 0x1bf   :  { %1778 = vmatpush.bf16.msra.mxu2 %v2327_v5 }
 0x1c0   :  { %1610 = vmatmul.bf16.gmra.mxu1 %v1525_v27 }
 0x1c3   :  { %1779 = vmatpush.bf16.msra.mxu2 %v2326_v33  ;;  %v1145_v60 = vpop.f32.mrf.mxu2 }
 0x1c5   :  { %v860_v31 = vpop.f32.mrf.mxu0  ;;  %v996_v20 = vpop.f32.mrf.mxu1 }
 0x1c6   :  { %v885_v40 = vadd.f32 %v860_v31, %v2912_v22  ;;  %v2954_v11 = vadd.f32 %v996_v20, %v2906_v54 }
 0x1c7   :  { %1780 = vmatpush.bf16.msra.mxu2 %v2325_v45 }
 0x1c8   :  { %1476 = vmatmul.bf16.gmra.mxu0 %v2794_v7  ;;  %v1515_v7 = vld [vmem:[#allocation2 + $0x92] sm:$0xff] }
 0x1c9   :  { %v1527_v62 = vpack.c.bf16 %v1515_v7, %v2864_v9 }
 0x1cb   :  { %1781 = vmatpush.bf16.msra.mxu2 %v2324_v48 }
 0x1cd   :  { %v862_v0 = vpop.f32.mrf.mxu0  ;;  %v999_v49 = vpop.f32.mrf.mxu1 }
 0x1ce   :  { %v886_v43 = vadd.f32 %v862_v0, %v2920_v23  ;;  %v2959_v17 = vadd.f32 %v999_v49, %v2915_v47 }
 0x1d0   :  { %1615 = vmatmul.bf16.gmra.mxu1 %v1526_v21 }
 0x1d5   :  { %v865_v58 = vpop.f32.mrf.mxu0  ;;  %v1001_v22 = vpop.f32.mrf.mxu1 }
 0x1d6   :  { %v887_v54 = vadd.f32 %v865_v58, %v2931_v28  ;;  %v2963_v1 = vadd.f32 %v1001_v22, %v2923_v30  ;;  %v1184_v22 = vadd.f32 %v1145_v60, %v2945_v59 }
 0x1d8   :  { %1481 = vmatmul.bf16.gmra.mxu0 %v2817_v16  ;;  %v1516_v16 = vld [vmem:[#allocation2 + $0xc2] sm:$0xff] }
 0x1d9   :  { %v1528_v9 = vpack.c.bf16 %v1517_v52, %v1516_v16 }
 0x1dd   :  { %v867_v51 = vpop.f32.mrf.mxu0  ;;  %v1004_v6 = vpop.f32.mrf.mxu1 }
 0x1de   :  { %v888_v23 = vadd.f32 %v867_v51, %v734_v18  ;;  %v2967_v47 = vadd.f32 %v1004_v6, %v2936_v44 }
 0x1e0   :  { %1620 = vmatmul.bf16.gmra.mxu1 %v1527_v62 }
 0x1e5   :  { %v870_v32 = vpop.f32.mrf.mxu0  ;;  %v1006_v28 = vpop.f32.mrf.mxu1 }
 0x1e6   :  { %v889_v19 = vadd.f32 %v870_v32, %v735_v41  ;;  %v2970_v30 = vadd.f32 %v1006_v28, %v882_v13 }
 0x1e8   :  { %1486 = vmatmul.bf16.gmra.mxu0 %v1377_v25 }
 0x1ed   :  { %v872_v18 = vpop.f32.mrf.mxu0  ;;  %v1009_v24 = vpop.f32.mrf.mxu1 }
 0x1ee   :  { %v890_v44 = vadd.f32 %v872_v18, %v736_v3  ;;  %v2973_v4 = vadd.f32 %v1009_v24, %v883_v34  ;;  %v1298_v34 = vpop.f32.mrf.mxu3 }
 0x1f0   :  { %1625 = vmatmul.bf16.gmra.mxu1 %v1528_v9 }
 0x1f5   :  { %v1011_v57 = vpop.f32.mrf.mxu1  ;;  %v1452_v29 = vpop.f32.mrf.mxu0 }
 0x1f6   :  { %v2975_v38 = vadd.f32 %v1011_v57, %v884_v56  ;;  %v1300_v42 = vpop.f32.mrf.mxu3  ;;  %v1523_v56 = vld [vmem:[#allocation2 + $0x132] sm:$0xff] }
 0x1f7   :  { %v1531_v20 = vpack.c.bf16 %v1523_v56, %v2929_v50  ;;  %v1339_v51 = vadd.f32 %v1300_v42, %v1184_v22  ;;  %v2997_v50 = vld [vmem:[%s3061_s5] ss:$0 sm:$0xff] }
 0x1fd   :  { %v1014_v13 = vpop.f32.mrf.mxu1  ;;  %v1454_v3 = vpop.f32.mrf.mxu0 }
 0x1fe   :  { %v2977_v41 = vadd.f32 %v1014_v13, %v885_v40  ;;  %v1303_v27 = vpop.f32.mrf.mxu3  ;;  %v1493_v62 = vadd.f32 %v1454_v3, %v1339_v51 }
 0x200   :  { %1630 = vmatmul.bf16.gmra.mxu1 %v2813_v15  ;;  %v1148_v15 = vpop.f32.mrf.mxu2 }
 0x201   :  { %v1185_v16 = vadd.f32 %v1148_v15, %v2950_v26 }
 0x205   :  { %v1016_v10 = vpop.f32.mrf.mxu1  ;;  %v1457_v40 = vpop.f32.mrf.mxu0 }
 0x206   :  { %v2980_v39 = vadd.f32 %v1016_v10, %v886_v43  ;;  %v1305_v0 = vpop.f32.mrf.mxu3  ;;  %v1183_v43 = vadd.f32 %v1143_v36, %v2941_v37 }
 0x208   :  { %v1150_v35 = vpop.f32.mrf.mxu2  ;;  %v1338_v2 = vadd.f32 %v1298_v34, %v1183_v43 }
 0x209   :  { %v1186_v9 = vadd.f32 %v1150_v35, %v2954_v11 }
 0x20b   :  { %v1341_v57 = vadd.f32 %v1305_v0, %v1186_v9 }
 0x20d   :  { %v1019_v12 = vpop.f32.mrf.mxu1  ;;  %v1459_v49 = vpop.f32.mrf.mxu0 }
 0x20e   :  { %v2982_v53 = vadd.f32 %v1019_v12, %v887_v54  ;;  %v1492_v54 = vadd.f32 %v1452_v29, %v1338_v2  ;;  %v1308_v7 = vpop.f32.mrf.mxu3  ;;  %v1495_v10 = vadd.f32 %v1459_v49, %v1341_v57 }
 0x210   :  { %1635 = vmatmul.bf16.gmra.mxu1 %v2835_v14  ;;  %v1153_v58 = vpop.f32.mrf.mxu2 }
 0x211   :  { %v1187_v3 = vadd.f32 %v1153_v58, %v2959_v17 }
 0x213   :  { %v1342_v56 = vadd.f32 %v1308_v7, %v1187_v3 }
 0x215   :  { %v1021_v8 = vpop.f32.mrf.mxu1 }
 0x216   :  { %v2985_v55 = vadd.f32 %v1021_v8, %v888_v23  ;;  %v1462_v23 = vpop.f32.mrf.mxu0  ;;  %v1310_v25 = vpop.f32.mrf.mxu3 }
 0x218   :  { %v1155_v28 = vpop.f32.mrf.mxu2 }
 0x21d   :  { %v1024_v61 = vpop.f32.mrf.mxu1 }
 0x21e   :  { %v2987_v31 = vadd.f32 %v1024_v61, %v889_v19  ;;  %v1464_v18 = vpop.f32.mrf.mxu0  ;;  %v1313_v36 = vpop.f32.mrf.mxu3  ;;  %v1188_v61 = vadd.f32 %v1155_v28, %v2963_v1 }
 0x220   :  { %1640 = vmatmul.bf16.gmra.mxu1 %v1531_v20  ;;  %v1158_v45 = vpop.f32.mrf.mxu2  ;;  %v1496_v20 = vadd.f32 %v1462_v23, %v1342_v56  ;;  %v1343_v35 = vadd.f32 %v1310_v25, %v1188_v61 }
 0x221   :  { %v1189_v51 = vadd.f32 %v1158_v45, %v2967_v47 }
 0x222   :  { %v1497_v0 = vadd.f32 %v1464_v18, %v1343_v35 }
 0x223   :  { %v1344_v23 = vadd.f32 %v1313_v36, %v1189_v51 }
 0x225   :  { %v1026_v14 = vpop.f32.mrf.mxu1 }
 0x226   :  { %v2990_v63 = vadd.f32 %v1026_v14, %v890_v44  ;;  %v1340_v44 = vadd.f32 %v1303_v27, %v1185_v16  ;;  %v1467_v60 = vpop.f32.mrf.mxu0  ;;  %v1315_v27 = vpop.f32.mrf.mxu3 }
 0x228   :  { %v1494_v33 = vadd.f32 %v1457_v40, %v1340_v44  ;;  %v1160_v15 = vpop.f32.mrf.mxu2 }
 0x22d   :  { %v1606_v21 = vpop.f32.mrf.mxu1 }
 0x22e   :  { %v1646_v6 = vadd.f32 %v1606_v21, %v1492_v54  ;;  %v1469_v40 = vpop.f32.mrf.mxu0  ;;  %v1318_v58 = vpop.f32.mrf.mxu3 }
 0x230   :  { %v1666_v5 = vadd.f32 %v2997_v50, %v1646_v6  ;;  %v1163_v2 = vpop.f32.mrf.mxu2 }
 0x231   :  { %v1191_v9 = vadd.f32 %v1163_v2, %v2973_v4 }
 0x232   :  { %v1682_v19 = vmax.f32 %v1666_v5, 0.0 }
 0x235   :  { %v1608_v46 = vpop.f32.mrf.mxu1 }
 0x236   :  { %v1647_v37 = vadd.f32 %v1608_v46, %v1493_v62  ;;  %v1472_v7 = vpop.f32.mrf.mxu0  ;;  %v1190_v62 = vadd.f32 %v1160_v15, %v2970_v30  ;;  %v1498_v46 = vadd.f32 %v1467_v60, %v1344_v23  ;;  %v1320_v28 = vpop.f32.mrf.mxu3 }
 0x238   :  { %v1667_v32 = vadd.f32 %v2997_v50, %v1647_v37  ;;  %v1165_v5 = vpop.f32.mrf.mxu2  ;;  %v1345_v37 = vadd.f32 %v1315_v27, %v1190_v62 }
 0x23a   :  { %v1683_v59 = vmax.f32 %v1667_v32, 0.0 }
 0x23c   :  { %v1698_v52 = vpack.c.bf16 %v1683_v59, %v1682_v19  ;;  %v1499_v19 = vadd.f32 %v1469_v40, %v1345_v37 }
 0x23d   :  { %v1611_v24 = vpop.f32.mrf.mxu1 }
 0x23e   :  { %1782 = vmatmul.bf16.vlgmr.msra.gmra.mxu2 %v1698_v52  ;;  %v1648_v13 = vadd.f32 %v1611_v24, %v1494_v33  ;;  %v1474_v59 = vpop.f32.mrf.mxu0  ;;  %v1323_v30 = vpop.f32.mrf.mxu3 }
 0x240   :  { %v1668_v29 = vadd.f32 %v2997_v50, %v1648_v13  ;;  %v1168_v44 = vpop.f32.mrf.mxu2  ;;  %v1346_v13 = vadd.f32 %v1318_v58, %v1191_v9 }
 0x241   :  { %v1193_v56 = vadd.f32 %v1168_v44, %v2977_v41 }
 0x242   :  { %v1684_v42 = vmax.f32 %v1668_v29, 0.0  ;;  %v1500_v36 = vadd.f32 %v1472_v7, %v1346_v13 }
 0x245   :  { %v1613_v34 = vpop.f32.mrf.mxu1 }
 0x246   :  { %v1649_v12 = vadd.f32 %v1613_v34, %v1495_v10  ;;  %v1477_v45 = vpop.f32.mrf.mxu0  ;;  %v1192_v10 = vadd.f32 %v1165_v5, %v2975_v38  ;;  %v1325_v3 = vpop.f32.mrf.mxu3  ;;  %v1348_v38 = vadd.f32 %v1323_v30, %v1193_v56 }
 0x248   :  { %v1669_v26 = vadd.f32 %v2997_v50, %v1649_v12  ;;  %v1347_v34 = vadd.f32 %v1320_v28, %v1192_v10  ;;  %v1170_v60 = vpop.f32.mrf.mxu2  ;;  %v1502_v35 = vadd.f32 %v1477_v45, %v1348_v38 }
 0x249   :  { %v1194_v40 = vadd.f32 %v1170_v60, %v2980_v39 }
 0x24a   :  { %v1685_v48 = vmax.f32 %v1669_v26, 0.0  ;;  %v1501_v12 = vadd.f32 %v1474_v59, %v1347_v34 }
 0x24c   :  { %v1699_v8 = vpack.c.bf16 %v1685_v48, %v1684_v42 }
 0x24d   :  { %v1616_v11 = vpop.f32.mrf.mxu1 }
 0x24e   :  { %1787 = vmatmul.bf16.gmra.mxu2 %v1699_v8  ;;  %v1650_v14 = vadd.f32 %v1616_v11, %v1496_v20  ;;  %v1479_v8 = vpop.f32.mrf.mxu0 }
 0x250   :  { %v1670_v43 = vadd.f32 %v2997_v50, %v1650_v14  ;;  %v1173_v20 = vpop.f32.mrf.mxu2  ;;  %v1328_v14 = vpop.f32.mrf.mxu3 }
 0x252   :  { %v1686_v22 = vmax.f32 %v1670_v43, 0.0 }
 0x255   :  { %v1618_v49 = vpop.f32.mrf.mxu1 }
 0x256   :  { %v1651_v21 = vadd.f32 %v1618_v49, %v1497_v0  ;;  %v1349_v0 = vadd.f32 %v1325_v3, %v1194_v40  ;;  %v1482_v43 = vpop.f32.mrf.mxu0 }
 0x258   :  { %v1671_v17 = vadd.f32 %v2997_v50, %v1651_v21  ;;  %v1503_v21 = vadd.f32 %v1479_v8, %v1349_v0  ;;  %v1175_v41 = vpop.f32.mrf.mxu2  ;;  %v1330_v51 = vpop.f32.mrf.mxu3 }
 0x25a   :  { %v1687_v54 = vmax.f32 %v1671_v17, 0.0 }
 0x25c   :  { %v1700_v6 = vpack.c.bf16 %v1687_v54, %v1686_v22 }
 0x25d   :  { %v1621_v1 = vpop.f32.mrf.mxu1 }
 0x25e   :  { %1792 = vmatmul.bf16.gmra.mxu2 %v1700_v6  ;;  %v1652_v32 = vadd.f32 %v1621_v1, %v1498_v46  ;;  %v1195_v6 = vadd.f32 %v1173_v20, %v2982_v53  ;;  %v1484_v39 = vpop.f32.mrf.mxu0  ;;  %v1196_v46 = vadd.f32 %v1175_v41, %v2985_v55 }
 0x260   :  { %v1672_v16 = vadd.f32 %v2997_v50, %v1652_v32  ;;  %v1350_v62 = vadd.f32 %v1328_v14, %v1195_v6  ;;  %v1351_v37 = vadd.f32 %v1330_v51, %v1196_v46  ;;  %v1178_v28 = vpop.f32.mrf.mxu2  ;;  %v1333_v59 = vpop.f32.mrf.mxu3  ;;  %v2371_v14 = vld [vmem:[#allocation3 + $0x10] sm:$0xff] }
 0x261   :  { %v1197_v44 = vadd.f32 %v1178_v28, %v2987_v31 }
 0x262   :  { %v1688_v47 = vmax.f32 %v1672_v16, 0.0  ;;  %v1504_v5 = vadd.f32 %v1482_v43, %v1350_v62 }
 0x263   :  { %v1352_v30 = vadd.f32 %v1333_v59, %v1197_v44 }
 0x265   :  { %v1623_v25 = vpop.f32.mrf.mxu1 }
 0x266   :  { %v1653_v52 = vadd.f32 %v1623_v25, %v1499_v19  ;;  %v1505_v19 = vadd.f32 %v1484_v39, %v1351_v37  ;;  %v2374_v39 = vld [vmem:[#allocation3 + $0x28] sm:$0xff]  ;;  %v2375_v37 = vld [vmem:[#allocation3 + $0x30] sm:$0xff] }
 0x268   :  { %v1673_v18 = vadd.f32 %v2997_v50, %v1653_v52 }
 0x26a   :  { %v1689_v24 = vmax.f32 %v1673_v18, 0.0  ;;  %v1487_v18 = vpop.f32.mrf.mxu0 }
 0x26b   :  { %v1506_v45 = vadd.f32 %v1487_v18, %v1352_v30 }
 0x26c   :  { %v1701_v33 = vpack.c.bf16 %v1689_v24, %v1688_v47 }
 0x26d   :  { %v1626_v57 = vpop.f32.mrf.mxu1 }
 0x26e   :  { %1797 = vmatmul.bf16.gmra.mxu2 %v1701_v33  ;;  %v1654_v29 = vadd.f32 %v1626_v57, %v1500_v36  ;;  %v1180_v33 = vpop.f32.mrf.mxu2  ;;  %v1335_v57 = vpop.f32.mrf.mxu3 }
 0x26f   :  { %v1198_v13 = vadd.f32 %v1180_v33, %v2990_v63 }
 0x270   :  { %v1674_v42 = vadd.f32 %v2997_v50, %v1654_v29 }
 0x271   :  { %v1353_v36 = vadd.f32 %v1335_v57, %v1198_v13 }
 0x272   :  { %v1690_v15 = vmax.f32 %v1674_v42, 0.0  ;;  %v1489_v10 = vpop.f32.mrf.mxu0 }
 0x273   :  { %v1507_v29 = vadd.f32 %v1489_v10, %v1353_v36  ;;  %v2379_v10 = vld [vmem:[#allocation3 + $0x50] sm:$0xff] }
 0x275   :  { %v1628_v26 = vpop.f32.mrf.mxu1 }
 0x276   :  { %v1655_v48 = vadd.f32 %v1628_v26, %v1501_v12 }
 0x278   :  { %v1675_v4 = vadd.f32 %v2997_v50, %v1655_v48 }
 0x27a   :  { %v1691_v11 = vmax.f32 %v1675_v4, 0.0  ;;  %v3032_v4 = vld [vmem:[%s3062_s6] ss:$0 sm:$0xff]  ;;  %s2522_s6 = smov [#allocation11]  }
 0x27b   :  { %s1875_s25 = sshll.u32 %s2522_s6, 4  ;;  %s1876_s25 = int_to_ptr.vmem [resolvable:$true] %s1875_s25 }
 0x27c   :  { %v1702_v27 = vpack.c.bf16 %v1691_v11, %v1690_v15  ;;  %v2369_v15 = vld [vmem:[#allocation3] sm:$0xff] }
 0x27d   :  { %v1631_v61 = vpop.f32.mrf.mxu1 }
 0x27e   :  { %1802 = vmatmul.bf16.gmra.mxu2 %v1702_v27  ;;  %v1656_v49 = vadd.f32 %v1631_v61, %v1502_v35 }
 0x280   :  { %v1676_v17 = vadd.f32 %v2997_v50, %v1656_v49 }
 0x282   :  { %v1692_v54 = vmax.f32 %v1676_v17, 0.0 }
 0x285   :  { %v1633_v2 = vpop.f32.mrf.mxu1 }
 0x286   :  { %v1657_v58 = vadd.f32 %v1633_v2, %v1503_v21  ;;  %v2372_v2 = vld [vmem:[#allocation3 + $0x18] sm:$0xff] }
 0x288   :  { %v1677_v22 = vadd.f32 %v2997_v50, %v1657_v58 }
 0x28a   :  { %v1693_v7 = vmax.f32 %v1677_v22, 0.0 }
 0x28c   :  { %v1703_v1 = vpack.c.bf16 %v1693_v7, %v1692_v54  ;;  %v2373_v54 = vld [vmem:[#allocation3 + $0x20] sm:$0xff] }
 0x28d   :  { %v1636_v23 = vpop.f32.mrf.mxu1 }
 0x28e   :  { %1807 = vmatmul.bf16.gmra.mxu2 %v1703_v1  ;;  %v1658_v32 = vadd.f32 %v1636_v23, %v1504_v5 }
 0x290   :  { %v1678_v16 = vadd.f32 %v2997_v50, %v1658_v32 }
 0x292   :  { %v1694_v47 = vmax.f32 %v1678_v16, 0.0 }
 0x295   :  { %v1638_v25 = vpop.f32.mrf.mxu1 }
 0x296   :  { %v1659_v52 = vadd.f32 %v1638_v25, %v1505_v19  ;;  %v2376_v25 = vld [vmem:[#allocation3 + $0x38] sm:$0xff] }
 0x298   :  { %v1679_v53 = vadd.f32 %v2997_v50, %v1659_v52 }
 0x29a   :  { %v1695_v24 = vmax.f32 %v1679_v53, 0.0 }
 0x29c   :  { %v1704_v9 = vpack.c.bf16 %v1695_v24, %v1694_v47  ;;  %v2377_v47 = vld [vmem:[#allocation3 + $0x40] sm:$0xff] }
 0x29d   :  { %v1641_v55 = vpop.f32.mrf.mxu1 }
 0x29e   :  { %1812 = vmatmul.bf16.gmra.mxu2 %v1704_v9  ;;  %v1660_v34 = vadd.f32 %v1641_v55, %v1506_v45  ;;  %v2378_v55 = vld [vmem:[#allocation3 + $0x48] sm:$0xff] }
 0x2a0   :  { %v1680_v60 = vadd.f32 %v2997_v50, %v1660_v34 }
 0x2a2   :  { %v1696_v31 = vmax.f32 %v1680_v60, 0.0  ;;  %v2380_v60 = vld [vmem:[#allocation3 + $0x58] sm:$0xff] }
 0x2a5   :  { %v1643_v12 = vpop.f32.mrf.mxu1 }
 0x2a6   :  { %v1661_v26 = vadd.f32 %v1643_v12, %v1507_v29 }
 0x2a8   :  { %v1681_v42 = vadd.f32 %v2997_v50, %v1661_v26  ;;  %v2370_v50 = vld [vmem:[#allocation3 + $0x8] sm:$0xff] }
 0x2aa   :  { %v1697_v48 = vmax.f32 %v1681_v42, 0.0 }
 0x2ac   :  { %v1705_v3 = vpack.c.bf16 %v1697_v48, %v1696_v31 }
 0x2ae   :  { %1817 = vmatmul.bf16.gmra.mxu2 %v1705_v3  ;;  %v2381_v3 = vld [vmem:[#allocation3 + $0x60] sm:$0xff] }
 0x2c1   :  { %v1783_v63 = vpop.f32.mrf.mxu2 }
 0x2c2   :  { %v1784_v8 = vadd.f32 %v3032_v4, %v1783_v63 }
 0x2c4   :  { %v1823_v11 = vadd.f32 %v2369_v15, %v1784_v8 }
 0x2c6   :  { %v1839_v56 = vmax.f32 %v1823_v11, 0.0 }
 0x2c8   :  { %1855 = vst [vmem:[#allocation11] sm:$0xff] %v1839_v56  ;;  %v2382_v56 = vld [vmem:[#allocation3 + $0x68] sm:$0xff] }
 0x2c9   :  { %v1785_v27 = vpop.f32.mrf.mxu2 }
 0x2ca   :  { %v1786_v61 = vadd.f32 %v3032_v4, %v1785_v27 }
 0x2cc   :  { %v1824_v38 = vadd.f32 %v2370_v50, %v1786_v61 }
 0x2ce   :  { %v1840_v20 = vmax.f32 %v1824_v38, 0.0 }
 0x2d0   :  { %1856 = vst [vmem:[#allocation11 + $0x8] sm:$0xff] %v1840_v20  ;;  %v2383_v20 = vld [vmem:[#allocation3 + $0x70] sm:$0xff] }
 0x2d1   :  { %v1788_v40 = vpop.f32.mrf.mxu2 }
 0x2d2   :  { %v1789_v35 = vadd.f32 %v3032_v4, %v1788_v40 }
 0x2d4   :  { %v1825_v0 = vadd.f32 %v2371_v14, %v1789_v35 }
 0x2d6   :  { %v1841_v49 = vmax.f32 %v1825_v0, 0.0 }
 0x2d8   :  { %1857 = vst [vmem:[#allocation11 + $0x10] sm:$0xff] %v1841_v49  ;;  %v2384_v49 = vld [vmem:[#allocation3 + $0x78] sm:$0xff] }
 0x2d9   :  { %v1790_v43 = vpop.f32.mrf.mxu2 }
 0x2da   :  { %v1791_v21 = vadd.f32 %v3032_v4, %v1790_v43 }
 0x2dc   :  { %v1826_v17 = vadd.f32 %v2372_v2, %v1791_v21 }
 0x2de   :  { %v1842_v58 = vmax.f32 %v1826_v17, 0.0 }
 0x2e0   :  { %1858 = vst [vmem:[#allocation11 + $0x18] sm:$0xff] %v1842_v58 }
 0x2e1   :  { %v1793_v22 = vpop.f32.mrf.mxu2 }
 0x2e2   :  { %v1794_v41 = vadd.f32 %v3032_v4, %v1793_v22 }
 0x2e4   :  { %v1827_v7 = vadd.f32 %v2373_v54, %v1794_v41 }
 0x2e6   :  { %v1843_v51 = vmax.f32 %v1827_v7, 0.0 }
 0x2e8   :  { %1859 = vst [vmem:[#allocation11 + $0x20] sm:$0xff] %v1843_v51 }
 0x2e9   :  { %v1795_v6 = vpop.f32.mrf.mxu2 }
 0x2ea   :  { %v1796_v1 = vadd.f32 %v3032_v4, %v1795_v6 }
 0x2ec   :  { %v1828_v23 = vadd.f32 %v2374_v39, %v1796_v1 }
 0x2ee   :  { %v1844_v62 = vmax.f32 %v1828_v23, 0.0 }
 0x2f0   :  { %1860 = vst [vmem:[#allocation11 + $0x28] sm:$0xff] %v1844_v62 }
 0x2f1   :  { %v1798_v46 = vpop.f32.mrf.mxu2 }
 0x2f2   :  { %v1799_v5 = vadd.f32 %v3032_v4, %v1798_v46 }
 0x2f4   :  { %v1829_v32 = vadd.f32 %v2375_v37, %v1799_v5 }
 0x2f6   :  { %v1845_v28 = vmax.f32 %v1829_v32, 0.0 }
 0x2f8   :  { %1861 = vst [vmem:[#allocation11 + $0x30] sm:$0xff] %v1845_v28 }
 0x2f9   :  { %v1800_v19 = vpop.f32.mrf.mxu2 }
 0x2fa   :  { %v1801_v59 = vadd.f32 %v3032_v4, %v1800_v19 }
 0x2fc   :  { %v1830_v16 = vadd.f32 %v2376_v25, %v1801_v59 }
 0x2fe   :  { %v1846_v52 = vmax.f32 %v1830_v16, 0.0 }
 0x300   :  { %1862 = vst [vmem:[#allocation11 + $0x38] sm:$0xff] %v1846_v52 }
 0x301   :  { %v1803_v18 = vpop.f32.mrf.mxu2 }
 0x302   :  { %v1804_v53 = vadd.f32 %v3032_v4, %v1803_v18 }
 0x304   :  { %v1831_v24 = vadd.f32 %v2377_v47, %v1804_v53 }
 0x306   :  { %v1847_v44 = vmax.f32 %v1831_v24, 0.0 }
 0x308   :  { %1863 = vst [vmem:[#allocation11 + $0x40] sm:$0xff] %v1847_v44 }
 0x309   :  { %v1805_v9 = vpop.f32.mrf.mxu2 }
 0x30a   :  { %v1806_v33 = vadd.f32 %v3032_v4, %v1805_v9 }
 0x30c   :  { %v1832_v30 = vadd.f32 %v2378_v55, %v1806_v33 }
 0x30e   :  { %v1848_v57 = vmax.f32 %v1832_v30, 0.0 }
 0x310   :  { %1864 = vst [vmem:[#allocation11 + $0x48] sm:$0xff] %v1848_v57 }
 0x311   :  { %v1808_v13 = vpop.f32.mrf.mxu2 }
 0x312   :  { %v1809_v45 = vadd.f32 %v3032_v4, %v1808_v13 }
 0x314   :  { %v1833_v36 = vadd.f32 %v2379_v10, %v1809_v45 }
 0x316   :  { %v1849_v34 = vmax.f32 %v1833_v36, 0.0 }
 0x318   :  { %1865 = vst [vmem:[#allocation11 + $0x50] sm:$0xff] %v1849_v34 }
 0x319   :  { %v1810_v29 = vpop.f32.mrf.mxu2 }
 0x31a   :  { %v1811_v12 = vadd.f32 %v3032_v4, %v1810_v29 }
 0x31c   :  { %v1834_v26 = vadd.f32 %v2380_v60, %v1811_v12 }
 0x31e   :  { %v1850_v42 = vmax.f32 %v1834_v26, 0.0 }
 0x320   :  { %1866 = vst [vmem:[#allocation11 + $0x58] sm:$0xff] %v1850_v42 }
 0x321   :  { %v1813_v31 = vpop.f32.mrf.mxu2 }
 0x322   :  { %v1814_v48 = vadd.f32 %v3032_v4, %v1813_v31 }
 0x324   :  { %v1835_v63 = vadd.f32 %v2381_v3, %v1814_v48 }
 0x326   :  { %v1851_v8 = vmax.f32 %v1835_v63, 0.0 }
 0x328   :  { %1867 = vst [vmem:[#allocation11 + $0x60] sm:$0xff] %v1851_v8 }
 0x329   :  { %v1815_v15 = vpop.f32.mrf.mxu2 }
 0x32a   :  { %v1816_v11 = vadd.f32 %v3032_v4, %v1815_v15 }
 0x32c   :  { %v1836_v27 = vadd.f32 %v2382_v56, %v1816_v11 }
 0x32e   :  { %v1852_v61 = vmax.f32 %v1836_v27, 0.0 }
 0x330   :  { %1868 = vst [vmem:[#allocation11 + $0x68] sm:$0xff] %v1852_v61 }
 0x331   :  { %v1818_v50 = vpop.f32.mrf.mxu2 }
 0x332   :  { %v1819_v38 = vadd.f32 %v3032_v4, %v1818_v50 }
 0x334   :  { %v1837_v40 = vadd.f32 %v2383_v20, %v1819_v38 }
 0x336   :  { %v1853_v35 = vmax.f32 %v1837_v40, 0.0 }
 0x338   :  { %1869 = vst [vmem:[#allocation11 + $0x70] sm:$0xff] %v1853_v35 }
 0x339   :  { %v1820_v14 = vpop.f32.mrf.mxu2 }
 0x33a   :  { %v1821_v0 = vadd.f32 %v3032_v4, %v1820_v14 }
 0x33c   :  { %v1838_v43 = vadd.f32 %v2384_v49, %v1821_v0 }
 0x33e   :  { %v1854_v21 = vmax.f32 %v1838_v43, 0.0 }
 0x340   :  { %1870 = vst [vmem:[#allocation11 + $0x78] sm:$0xff] %v1854_v21 }
 0x341   :  { %1883 = dma.vmem_to_hbm [thread:$0]  %s1876_s25, 2048, %s1878_s28, [#allocation5], %s2517_s13, %s2517_s13, %s2518_s14  }
 0x342   :  { %2511 = dma.done.wait [#allocation5], 2048  }
 0x343   :  { %2512 = vsyncadd [#allocation5], 4294965248 }
 0x344   :  { %1888 = vsyncpa [#allocation4], 1 }
 0x345   :  { %1889 = vsyncpa [#allocation7], 1 }
 0x346   :  { %1890 = vsyncpa [#allocation10], 1 }
 0x347   :  { %1891 = vsyncpa [#allocation5], 1 }

</bundles_post_ra>
